<compile_context>
chip_gen: v7x
topology: tpu7x:2x2x1
jax: 0.10.0
libtpu: 0.0.40
codegen_flags: <defaults>
</compile_context>

<pallas_src>
import functools
import math

import jax
import jax.numpy as jnp
from jax.experimental import pallas as pl
from jax.experimental.pallas import tpu as pltpu


# ----------------------------- small helpers -------------------------------

def _row_tile(m, target=512):
    """Largest row tile (multiple of 8, <= target) giving >= 2 grid steps."""
    cand = target
    while cand >= 8:
        if m % cand == 0 and m // cand >= 2:
            return cand
        cand //= 2
    return m


def _lane_tile(n, target=512):
    """Full N when N <= target (lane-dense single slab), else a 128-multiple."""
    if n <= target:
        return n
    cand = target
    while cand >= 128:
        if n % cand == 0:
            return cand
        cand //= 2
    return n


def _gelu(y):
    # tanh-approx GELU (EUP-friendly); exact erf-GELU differs < 1e-3.
    c = math.sqrt(2.0 / math.pi)
    return 0.5 * y * (1.0 + jnp.tanh(c * (y + 0.044715 * y * y * y)))


def _layernorm_rows(y, g, b, eps=1e-12):
    mu = jnp.mean(y, axis=-1, keepdims=True)
    var = jnp.mean(jnp.square(y - mu), axis=-1, keepdims=True)
    return (y - mu) * jax.lax.rsqrt(var + eps) * g + b


# --------------------- fused encoder kernel (grid = B x L) -----------------

def _encoder_layer_kernel(x_ref, mask_ref, emb_g_ref, emb_b_ref,
                          wqkv_ref, bqkv_ref, wo_ref, bo_ref,
                          ln1_g_ref, ln1_b_ref,
                          wi_ref, bi_ref, wf_ref, bf_ref,
                          ln2_g_ref, ln2_b_ref,
                          o_ref, h_carry, *, num_heads, scale):
    """One (batch element, layer) step; hidden state carried in VMEM scratch."""
    layer = pl.program_id(1)
    S, H = h_carry.shape
    hd = H // num_heads

    # Layer 0: initialize the per-batch carried hidden state from the
    # embeddings; the embedding LayerNorm is fused here (no standalone LN
    # pallas_call, no extra HBM round-trip of the embeddings).
    @pl.when(layer == 0)
    def _():
        h_carry[...] = _layernorm_rows(x_ref[...].astype(jnp.float32),
                                       emb_g_ref[...], emb_b_ref[...])

    x = h_carry[...]                                   # (S, H) f32 residual
    xb = x.astype(jnp.bfloat16)

    # ---- attention: fused QKV matmul (bf16 weights straight from HBM) ----
    qkv = jnp.dot(xb, wqkv_ref[...],
                  preferred_element_type=jnp.float32) + bqkv_ref[...]

    def heads(z):                                      # (S, H) -> (nH, S, hd)
        return jnp.transpose(z.astype(jnp.bfloat16).reshape(S, num_heads, hd),
                             (1, 0, 2))

    qh = heads(qkv[:, 0 * H:1 * H])                    # 128-lane-wide slices
    kh = heads(qkv[:, 1 * H:2 * H])
    vh = heads(qkv[:, 2 * H:3 * H])

    # head-batched score / context matmuls (no per-head unroll, no concat)
    s = jnp.einsum("hqd,hkd->hqk", qh, kh,
                   preferred_element_type=jnp.float32) * scale
    s = s + mask_ref[...]                              # (1, S) additive key mask
    s = s - jnp.max(s, axis=-1, keepdims=True)
    p = jnp.exp(s)
    p = p * pl.reciprocal(jnp.sum(p, axis=-1, keepdims=True), approx=True)
    ctx = jnp.einsum("hqk,hkd->hqd", p.astype(jnp.bfloat16), vh,
                     preferred_element_type=jnp.float32)      # (nH, S, hd)
    ctx = jnp.transpose(ctx, (1, 0, 2)).reshape(S, H)         # merge heads

    attn = jnp.dot(ctx.astype(jnp.bfloat16), wo_ref[...],
                   preferred_element_type=jnp.float32) + bo_ref[...]
    h1 = _layernorm_rows(attn + x, ln1_g_ref[...], ln1_b_ref[...])

    # ---- FFN: wi -> GELU -> wf -> residual -> LN (intermediate never in HBM)
    ff = jnp.dot(h1.astype(jnp.bfloat16), wi_ref[...],
                 preferred_element_type=jnp.float32) + bi_ref[...]
    ff = _gelu(ff)
    y = jnp.dot(ff.astype(jnp.bfloat16), wf_ref[...],
                preferred_element_type=jnp.float32) + bf_ref[...]
    h2 = _layernorm_rows(y + h1, ln2_g_ref[...], ln2_b_ref[...])

    h_carry[...] = h2
    # Output block index is constant over the layer axis -> VMEM-resident;
    # writing every step is cheap and the final write is what lands in HBM.
    o_ref[...] = h2.reshape(o_ref.shape).astype(o_ref.dtype)


def encoder_stack(x_emb, mask_bias, params, *, num_heads, scale):
    """x_emb: [B, S, H] f32; mask_bias: [B, 1, S] additive key mask."""
    B, S, H = x_emb.shape
    L = params["wqkv"].shape[0]
    I = params["wi"].shape[2]

    kernel = functools.partial(_encoder_layer_kernel,
                               num_heads=num_heads, scale=scale)

    bmap = lambda b, l: (b, 0, 0)     # per-batch blocks (constant over layers)
    lmap = lambda b, l: (l, 0, 0)     # per-layer stacked weights
    cmap = lambda b, l: (0, 0)        # shared embedding-LN params

    in_specs = [
        pl.BlockSpec((None, S, H), bmap),            # embeddings
        pl.BlockSpec((None, 1, S), bmap),            # attention-mask bias
        pl.BlockSpec((1, H), cmap),                  # emb LN gamma
        pl.BlockSpec((1, H), cmap),                  # emb LN beta
        pl.BlockSpec((None, H, 3 * H), lmap),        # wqkv (bf16)
        pl.BlockSpec((None, 1, 3 * H), lmap),        # bqkv
        pl.BlockSpec((None, H, H), lmap),            # wo   (bf16)
        pl.BlockSpec((None, 1, H), lmap),            # bo
        pl.BlockSpec((None, 1, H), lmap),            # ln1 gamma
        pl.BlockSpec((None, 1, H), lmap),            # ln1 beta
        pl.BlockSpec((None, H, I), lmap),            # wi   (bf16)
        pl.BlockSpec((None, 1, I), lmap),            # bi
        pl.BlockSpec((None, I, H), lmap),            # wf   (bf16)
        pl.BlockSpec((None, 1, H), lmap),            # bf
        pl.BlockSpec((None, 1, H), lmap),            # ln2 gamma
        pl.BlockSpec((None, 1, H), lmap),            # ln2 beta
    ]

    return pl.pallas_call(
        kernel,
        out_shape=jax.ShapeDtypeStruct((B, S, H), jnp.float32),
        grid=(B, L),
        in_specs=in_specs,
        out_specs=pl.BlockSpec((1, S, H), bmap),
        scratch_shapes=[pltpu.VMEM((S, H), jnp.float32)],
        compiler_params=pltpu.CompilerParams(
            dimension_semantics=("parallel", "arbitrary"),
            vmem_limit_bytes=48 * 1024 * 1024),      # ~25% headroom on v7x
    )(x_emb, mask_bias, params["emb_ln_g"], params["emb_ln_b"],
      params["wqkv"], params["bqkv"], params["wo"], params["bo"],
      params["ln1_g"], params["ln1_b"],
      params["wi"], params["bi"], params["wf"], params["bf"],
      params["ln2_g"], params["ln2_b"])


# ------------------------------ decoder linear ------------------------------

def _linear_kernel(x_ref, w_ref, b_ref, o_ref):
    # bf16 MXU operands (weight already bf16 in HBM), f32 accumulation.
    x = x_ref[...].astype(jnp.bfloat16)
    y = jnp.dot(x, w_ref[...], preferred_element_type=jnp.float32) + b_ref[...]
    o_ref[...] = y.astype(o_ref.dtype)


def linear(x, w, b):
    """y = x @ w + b, tiled over rows (M) and output lanes (N); w is bf16."""
    M, K = x.shape
    K2, N = w.shape
    assert K == K2
    tm = _row_tile(M)
    bn = _lane_tile(N)
    grid = (M // tm, N // bn)
    return pl.pallas_call(
        _linear_kernel,
        out_shape=jax.ShapeDtypeStruct((M, N), x.dtype),
        grid=grid,
        in_specs=[
            pl.BlockSpec((tm, K), lambda i, j: (i, 0)),
            pl.BlockSpec((K, bn), lambda i, j: (0, j)),
            pl.BlockSpec((1, bn), lambda i, j: (0, j)),
        ],
        out_specs=pl.BlockSpec((tm, bn), lambda i, j: (i, j)),
        compiler_params=pltpu.CompilerParams(
            dimension_semantics=("parallel", "parallel"),
            vmem_limit_bytes=48 * 1024 * 1024),
    )(x, w, b.reshape(1, N))


# ------------------------------ model wrapper -------------------------------

# TODO(synk): BertModel.from_pretrained / BertTokenizer are replaced with a
# small deterministically-initialized BERT-style encoder (no checkpoint load).
def init_params(key, *, vocab=256, hidden=128, layers=2, heads=4,
                inter=256, max_pos=16):
    std = 0.02
    wdt = jnp.bfloat16          # matmul weights live in HBM as bf16

    def nrm(k, shape, dtype=jnp.float32):
        return (std * jax.random.normal(k, shape)).astype(dtype)

    keys = jax.random.split(key, 8)
    return {
        "num_heads": heads,
        "word_emb": nrm(keys[0], (vocab, hidden)),
        "pos_emb": nrm(keys[1], (max_pos, hidden)),
        "type_emb": nrm(keys[2], (2, hidden)),
        "emb_ln_g": jnp.ones((1, hidden), jnp.float32),
        "emb_ln_b": jnp.zeros((1, hidden), jnp.float32),
        # stacked per-layer weights [L, ...] selected by index_map
        "wqkv": nrm(keys[3], (layers, hidden, 3 * hidden), wdt),
        "bqkv": jnp.zeros((layers, 1, 3 * hidden), jnp.float32),
        "wo": nrm(keys[4], (layers, hidden, hidden), wdt),
        "bo": jnp.zeros((layers, 1, hidden), jnp.float32),
        "ln1_g": jnp.ones((layers, 1, hidden), jnp.float32),
        "ln1_b": jnp.zeros((layers, 1, hidden), jnp.float32),
        "wi": nrm(keys[5], (layers, hidden, inter), wdt),
        "bi": jnp.zeros((layers, 1, inter), jnp.float32),
        "wf": nrm(keys[6], (layers, inter, hidden), wdt),
        "bf": jnp.zeros((layers, 1, hidden), jnp.float32),
        "ln2_g": jnp.ones((layers, 1, hidden), jnp.float32),
        "ln2_b": jnp.zeros((layers, 1, hidden), jnp.float32),
        # decoder Linear(hidden, num_labels)
        "w_dec": nrm(keys[7], (hidden, vocab), wdt),
        "b_dec": jnp.zeros((vocab,), jnp.float32),
    }


def bert_summarizer_forward(params, input_ids, attention_mask, labels=None):
    """Mirrors BertSummarizer.forward: logits [B,S,num_labels] (and CE loss)."""
    B, S = input_ids.shape
    H = params["word_emb"].shape[1]
    nH = params["num_heads"]
    scale = 1.0 / math.sqrt(H // nH)

    # ---- embeddings (gather is glue, kept in plain JAX) ----
    x = jnp.take(params["word_emb"], input_ids, axis=0)           # [B, S, H]
    x = x + params["pos_emb"][:S][None, :, :]
    x = x + params["type_emb"][0][None, None, :]

    # additive attention-mask bias: 0 where attended, -1e9 at padding keys
    mask_bias = ((1.0 - attention_mask.astype(jnp.float32)) * -1e9)
    mask_bias = mask_bias.reshape(B, 1, S)

    # ---- fused encoder: embedding LN + all transformer layers, ONE call ----
    h = encoder_stack(x, mask_bias, params, num_heads=nH, scale=scale)

    # ---- decoder head: logits over num_labels ----
    num_labels = params["w_dec"].shape[1]
    logits = linear(h.reshape(B * S, H), params["w_dec"], params["b_dec"])
    logits = logits.reshape(B, S, num_labels)

    if labels is not None:
        # CrossEntropyLoss over flattened tokens (reduction glue in plain JAX)
        logp = jax.nn.log_softmax(logits.reshape(B * S, num_labels), axis=-1)
        nll = -jnp.take_along_axis(logp, labels.reshape(B * S, 1), axis=-1)
        loss = jnp.mean(nll)
        return loss, logits
    return logits


# ---------------------------------- main ------------------------------------

if __name__ == "__main__":
    VOCAB = 256      # stands in for num_labels=30522 / BERT vocab (synthetic)
    B, S = 2, 8

    key = jax.random.PRNGKey(0)
    pkey, ikey = jax.random.split(key)
    params = init_params(pkey, vocab=VOCAB, hidden=128, layers=2,
                         heads=4, inter=256, max_pos=16)

    input_ids = jax.random.randint(ikey, (B, S), 0, VOCAB, dtype=jnp.int32)
    attention_mask = jnp.ones((B, S), dtype=jnp.int32)
    attention_mask = attention_mask.at[1, 6:].set(0)   # some padding positions

    logits = bert_summarizer_forward(params, input_ids, attention_mask)
    logits = jax.block_until_ready(logits)
    assert logits.shape == (B, S, VOCAB) and logits.dtype == jnp.float32
    assert bool(jnp.isfinite(logits).all())

    # also exercise the labels path (loss, logits)
    labels = jax.random.randint(jax.random.PRNGKey(1), (B, S), 0, VOCAB,
                                dtype=jnp.int32)
    loss, _ = bert_summarizer_forward(params, input_ids, attention_mask, labels)
    jax.block_until_ready(loss)
    assert bool(jnp.isfinite(loss))

    print("KERNEL_OK")
</pallas_src>

<mosaic_0001>
module attributes {stable_mosaic.version = 11 : i64} {
  func.func @_encoder_layer_kernel(%arg0: i32, %arg1: i32, %arg2: memref<1x8x128xf32, #tpu.memory_space<vmem>>, %arg3: memref<1x1x8xf32, #tpu.memory_space<vmem>>, %arg4: memref<1x128xf32, #tpu.memory_space<vmem>>, %arg5: memref<1x128xf32, #tpu.memory_space<vmem>>, %arg6: memref<1x128x384xbf16, #tpu.memory_space<vmem>>, %arg7: memref<1x1x384xf32, #tpu.memory_space<vmem>>, %arg8: memref<1x128x128xbf16, #tpu.memory_space<vmem>>, %arg9: memref<1x1x128xf32, #tpu.memory_space<vmem>>, %arg10: memref<1x1x128xf32, #tpu.memory_space<vmem>>, %arg11: memref<1x1x128xf32, #tpu.memory_space<vmem>>, %arg12: memref<1x128x256xbf16, #tpu.memory_space<vmem>>, %arg13: memref<1x1x256xf32, #tpu.memory_space<vmem>>, %arg14: memref<1x256x128xbf16, #tpu.memory_space<vmem>>, %arg15: memref<1x1x128xf32, #tpu.memory_space<vmem>>, %arg16: memref<1x1x128xf32, #tpu.memory_space<vmem>>, %arg17: memref<1x1x128xf32, #tpu.memory_space<vmem>>, %arg18: memref<1x8x128xf32, #tpu.memory_space<vmem>>, %arg19: memref<8x128xf32, #tpu.memory_space<vmem>>) attributes {dimension_semantics = [#tpu.dimension_semantics<parallel>, #tpu.dimension_semantics<arbitrary>], iteration_bounds = array<i64: 2, 2>, scalar_prefetch = 0 : i64, scratch_operands = 1 : i64, tpu.core_type = #tpu.core_type<tc>, window_params = [{transform_indices = @transform_0, window_bounds = array<i64: 1, 8, 128>}, {transform_indices = @transform_1, window_bounds = array<i64: 1, 1, 8>}, {pipeline_mode = #tpu.pipeline_mode<synchronous>, transform_indices = @transform_2, window_bounds = array<i64: 1, 128>}, {pipeline_mode = #tpu.pipeline_mode<synchronous>, transform_indices = @transform_3, window_bounds = array<i64: 1, 128>}, {transform_indices = @transform_4, window_bounds = array<i64: 1, 128, 384>}, {transform_indices = @transform_5, window_bounds = array<i64: 1, 1, 384>}, {transform_indices = @transform_6, window_bounds = array<i64: 1, 128, 128>}, {transform_indices = @transform_7, window_bounds = array<i64: 1, 1, 128>}, {transform_indices = @transform_8, window_bounds = array<i64: 1, 1, 128>}, {transform_indices = @transform_9, window_bounds = array<i64: 1, 1, 128>}, {transform_indices = @transform_10, window_bounds = array<i64: 1, 128, 256>}, {transform_indices = @transform_11, window_bounds = array<i64: 1, 1, 256>}, {transform_indices = @transform_12, window_bounds = array<i64: 1, 256, 128>}, {transform_indices = @transform_13, window_bounds = array<i64: 1, 1, 128>}, {transform_indices = @transform_14, window_bounds = array<i64: 1, 1, 128>}, {transform_indices = @transform_15, window_bounds = array<i64: 1, 1, 128>}, {transform_indices = @transform_16, window_bounds = array<i64: 1, 8, 128>}]} {
    %c0_i32 = arith.constant 0 : i32
    %0 = arith.cmpi eq, %arg1, %c0_i32 : i32
    %1 = arith.extui %0 : i1 to i32
    %c0_i32_0 = arith.constant 0 : i32
    %2 = arith.cmpi ne, %1, %c0_i32_0 : i32
    scf.if %2 {
      %c0_68 = arith.constant 0 : index
      %c0_69 = arith.constant 0 : index
      %c0_70 = arith.constant 0 : index
      %140 = vector.load %arg2[%c0_68, %c0_69, %c0_70] : memref<1x8x128xf32, #tpu.memory_space<vmem>>, vector<1x8x128xf32>
      %141 = vector.shape_cast %140 : vector<1x8x128xf32> to vector<8x128xf32>
      %c0_71 = arith.constant 0 : index
      %c0_72 = arith.constant 0 : index
      %142 = vector.load %arg4[%c0_71, %c0_72] : memref<1x128xf32, #tpu.memory_space<vmem>>, vector<1x128xf32>
      %c0_73 = arith.constant 0 : index
      %c0_74 = arith.constant 0 : index
      %143 = vector.load %arg5[%c0_73, %c0_74] : memref<1x128xf32, #tpu.memory_space<vmem>>, vector<1x128xf32>
      %cst_75 = arith.constant dense<0.000000e+00> : vector<8xf32>
      %144 = vector.multi_reduction <add>, %141, %cst_75 [1] : vector<8x128xf32> to vector<8xf32>
      %145 = vector.shape_cast %144 : vector<8xf32> to vector<8x1xf32>
      %cst_76 = arith.constant 1.280000e+02 : f32
      %146 = vector.broadcast %cst_76 : f32 to vector<8x1xf32>
      %147 = arith.divf %145, %146 : vector<8x1xf32>
      %148 = vector.broadcast %147 : vector<8x1xf32> to vector<8x128xf32>
      %149 = arith.subf %141, %148 : vector<8x128xf32>
      %150 = arith.mulf %149, %149 : vector<8x128xf32>
      %cst_77 = arith.constant dense<0.000000e+00> : vector<8xf32>
      %151 = vector.multi_reduction <add>, %150, %cst_77 [1] : vector<8x128xf32> to vector<8xf32>
      %152 = vector.shape_cast %151 : vector<8xf32> to vector<8x1xf32>
      %cst_78 = arith.constant 1.280000e+02 : f32
      %153 = vector.broadcast %cst_78 : f32 to vector<8x1xf32>
      %154 = arith.divf %152, %153 : vector<8x1xf32>
      %155 = vector.broadcast %147 : vector<8x1xf32> to vector<8x128xf32>
      %156 = arith.subf %141, %155 : vector<8x128xf32>
      %cst_79 = arith.constant 9.99999996E-13 : f32
      %157 = vector.broadcast %cst_79 : f32 to vector<8x1xf32>
      %158 = arith.addf %154, %157 : vector<8x1xf32>
      %159 = math.rsqrt %158 : vector<8x1xf32>
      %160 = vector.broadcast %159 : vector<8x1xf32> to vector<8x128xf32>
      %161 = arith.mulf %156, %160 : vector<8x128xf32>
      %162 = vector.broadcast %142 : vector<1x128xf32> to vector<8x128xf32>
      %163 = arith.mulf %161, %162 : vector<8x128xf32>
      %164 = vector.broadcast %143 : vector<1x128xf32> to vector<8x128xf32>
      %165 = arith.addf %163, %164 : vector<8x128xf32>
      %c0_80 = arith.constant 0 : index
      %c0_81 = arith.constant 0 : index
      %166 = vector.load %arg19[%c0_80, %c0_81] : memref<8x128xf32, #tpu.memory_space<vmem>>, vector<8x128xf32>
      tpu.vector_store %arg19[%c0_80, %c0_81], %165 {strides = array<i32>} : memref<8x128xf32, #tpu.memory_space<vmem>>, vector<8x128xf32>,
    } else {
    }
    %c0 = arith.constant 0 : index
    %c0_1 = arith.constant 0 : index
    %3 = vector.load %arg19[%c0, %c0_1] : memref<8x128xf32, #tpu.memory_space<vmem>>, vector<8x128xf32>
    %4 = arith.truncf %3 : vector<8x128xf32> to vector<8x128xbf16>
    %c0_2 = arith.constant 0 : index
    %c0_3 = arith.constant 0 : index
    %c0_4 = arith.constant 0 : index
    %5 = vector.load %arg6[%c0_2, %c0_3, %c0_4] : memref<1x128x384xbf16, #tpu.memory_space<vmem>>, vector<1x128x384xbf16>
    %6 = vector.shape_cast %5 : vector<1x128x384xbf16> to vector<128x384xbf16>
    %cst = arith.constant dense<0.000000e+00> : vector<8x384xf32>
    %7 = tpu.matmul %4, %6, %cst {dimension_numbers = #tpu.dot_dimension_numbers<[1], [0], [0], [1], [0, 0, 1, 1], [], []>} : vector<8x128xbf16>, vector<128x384xbf16>, vector<8x384xf32> -> vector<8x384xf32>
    %c0_5 = arith.constant 0 : index
    %c0_6 = arith.constant 0 : index
    %c0_7 = arith.constant 0 : index
    %8 = vector.load %arg7[%c0_5, %c0_6, %c0_7] : memref<1x1x384xf32, #tpu.memory_space<vmem>>, vector<1x1x384xf32>
    %9 = vector.shape_cast %8 : vector<1x1x384xf32> to vector<1x384xf32>
    %10 = vector.broadcast %9 : vector<1x384xf32> to vector<8x384xf32>
    %11 = arith.addf %7, %10 : vector<8x384xf32>
    %12 = vector.extract_strided_slice %11 {offsets = [0, 0], sizes = [8, 128], strides = [1, 1]} : vector<8x384xf32> to vector<8x128xf32>
    %13 = arith.truncf %12 : vector<8x128xf32> to vector<8x128xbf16>
    %14 = vector.shape_cast %13 : vector<8x128xbf16> to vector<8x4x32xbf16>
    %15 = tpu.transpose %14, [1, 0, 2] : vector<8x4x32xbf16> -> vector<4x8x32xbf16>
    %16 = vector.extract_strided_slice %11 {offsets = [0, 128], sizes = [8, 128], strides = [1, 1]} : vector<8x384xf32> to vector<8x128xf32>
    %17 = arith.truncf %16 : vector<8x128xf32> to vector<8x128xbf16>
    %18 = vector.shape_cast %17 : vector<8x128xbf16> to vector<8x4x32xbf16>
    %19 = tpu.transpose %18, [1, 0, 2] : vector<8x4x32xbf16> -> vector<4x8x32xbf16>
    %20 = vector.extract_strided_slice %11 {offsets = [0, 256], sizes = [8, 128], strides = [1, 1]} : vector<8x384xf32> to vector<8x128xf32>
    %21 = arith.truncf %20 : vector<8x128xf32> to vector<8x128xbf16>
    %22 = vector.shape_cast %21 : vector<8x128xbf16> to vector<8x4x32xbf16>
    %23 = tpu.transpose %22, [1, 0, 2] : vector<8x4x32xbf16> -> vector<4x8x32xbf16>
    "tpu.trace_start"() <{level = 10 : i32, message = "hqd,hkd->hqk"}> : () -> ()
    %cst_8 = arith.constant dense<0.000000e+00> : vector<4x8x8xf32>
    %24 = tpu.matmul %15, %19, %cst_8 {dimension_numbers = #tpu.dot_dimension_numbers<[2], [2], [1], [1], [0, 0, 0, 1, 1, 1], [0], [0]>} : vector<4x8x32xbf16>, vector<4x8x32xbf16>, vector<4x8x8xf32> -> vector<4x8x8xf32>
    "tpu.trace_stop"() : () -> ()
    %cst_9 = arith.constant 0.176776692 : f32
    %25 = vector.broadcast %cst_9 : f32 to vector<4x8x8xf32>
    %26 = arith.mulf %24, %25 : vector<4x8x8xf32>
    %c0_10 = arith.constant 0 : index
    %c0_11 = arith.constant 0 : index
    %c0_12 = arith.constant 0 : index
    %27 = vector.load %arg3[%c0_10, %c0_11, %c0_12] : memref<1x1x8xf32, #tpu.memory_space<vmem>>, vector<1x1x8xf32>
    %28 = vector.shape_cast %27 : vector<1x1x8xf32> to vector<1x8xf32>
    %29 = vector.shape_cast %28 : vector<1x8xf32> to vector<1x1x8xf32>
    %30 = vector.broadcast %29 : vector<1x1x8xf32> to vector<4x8x8xf32>
    %31 = arith.addf %26, %30 : vector<4x8x8xf32>
    %cst_13 = arith.constant dense<0xFF800000> : vector<4x8xf32>
    %32 = vector.multi_reduction <maximumf>, %31, %cst_13 [2] : vector<4x8x8xf32> to vector<4x8xf32>
    %33 = vector.shape_cast %32 : vector<4x8xf32> to vector<4x8x1xf32>
    %34 = vector.broadcast %33 : vector<4x8x1xf32> to vector<4x8x8xf32>
    %35 = arith.subf %31, %34 : vector<4x8x8xf32>
    %36 = math.exp %35 : vector<4x8x8xf32>
    %cst_14 = arith.constant dense<0.000000e+00> : vector<4x8xf32>
    %37 = vector.multi_reduction <add>, %36, %cst_14 [2] : vector<4x8x8xf32> to vector<4x8xf32>
    %38 = vector.shape_cast %37 : vector<4x8xf32> to vector<4x8x1xf32>
    %39 = tpu.reciprocal %38 {approx = true} : vector<4x8x1xf32> -> vector<4x8x1xf32>
    %40 = vector.broadcast %39 : vector<4x8x1xf32> to vector<4x8x8xf32>
    %41 = arith.mulf %36, %40 : vector<4x8x8xf32>
    %42 = arith.truncf %41 : vector<4x8x8xf32> to vector<4x8x8xbf16>
    "tpu.trace_start"() <{level = 10 : i32, message = "hqk,hkd->hqd"}> : () -> ()
    %cst_15 = arith.constant dense<0.000000e+00> : vector<4x8x32xf32>
    %43 = tpu.matmul %42, %23, %cst_15 {dimension_numbers = #tpu.dot_dimension_numbers<[2], [1], [1], [2], [0, 0, 0, 1, 1, 2], [0], [0]>} : vector<4x8x8xbf16>, vector<4x8x32xbf16>, vector<4x8x32xf32> -> vector<4x8x32xf32>
    "tpu.trace_stop"() : () -> ()
    %44 = tpu.transpose %43, [1, 0, 2] : vector<4x8x32xf32> -> vector<8x4x32xf32>
    %45 = vector.shape_cast %44 : vector<8x4x32xf32> to vector<8x128xf32>
    %46 = arith.truncf %45 : vector<8x128xf32> to vector<8x128xbf16>
    %c0_16 = arith.constant 0 : index
    %c0_17 = arith.constant 0 : index
    %c0_18 = arith.constant 0 : index
    %47 = vector.load %arg8[%c0_16, %c0_17, %c0_18] : memref<1x128x128xbf16, #tpu.memory_space<vmem>>, vector<1x128x128xbf16>
    %48 = vector.shape_cast %47 : vector<1x128x128xbf16> to vector<128x128xbf16>
    %cst_19 = arith.constant dense<0.000000e+00> : vector<8x128xf32>
    %49 = tpu.matmul %46, %48, %cst_19 {dimension_numbers = #tpu.dot_dimension_numbers<[1], [0], [0], [1], [0, 0, 1, 1], [], []>} : vector<8x128xbf16>, vector<128x128xbf16>, vector<8x128xf32> -> vector<8x128xf32>
    %c0_20 = arith.constant 0 : index
    %c0_21 = arith.constant 0 : index
    %c0_22 = arith.constant 0 : index
    %50 = vector.load %arg9[%c0_20, %c0_21, %c0_22] : memref<1x1x128xf32, #tpu.memory_space<vmem>>, vector<1x1x128xf32>
    %51 = vector.shape_cast %50 : vector<1x1x128xf32> to vector<1x128xf32>
    %52 = vector.broadcast %51 : vector<1x128xf32> to vector<8x128xf32>
    %53 = arith.addf %49, %52 : vector<8x128xf32>
    %54 = arith.addf %53, %3 : vector<8x128xf32>
    %c0_23 = arith.constant 0 : index
    %c0_24 = arith.constant 0 : index
    %c0_25 = arith.constant 0 : index
    %55 = vector.load %arg10[%c0_23, %c0_24, %c0_25] : memref<1x1x128xf32, #tpu.memory_space<vmem>>, vector<1x1x128xf32>
    %56 = vector.shape_cast %55 : vector<1x1x128xf32> to vector<1x128xf32>
    %c0_26 = arith.constant 0 : index
    %c0_27 = arith.constant 0 : index
    %c0_28 = arith.constant 0 : index
    %57 = vector.load %arg11[%c0_26, %c0_27, %c0_28] : memref<1x1x128xf32, #tpu.memory_space<vmem>>, vector<1x1x128xf32>
    %58 = vector.shape_cast %57 : vector<1x1x128xf32> to vector<1x128xf32>
    %cst_29 = arith.constant dense<0.000000e+00> : vector<8xf32>
    %59 = vector.multi_reduction <add>, %54, %cst_29 [1] : vector<8x128xf32> to vector<8xf32>
    %60 = vector.shape_cast %59 : vector<8xf32> to vector<8x1xf32>
    %cst_30 = arith.constant 1.280000e+02 : f32
    %61 = vector.broadcast %cst_30 : f32 to vector<8x1xf32>
    %62 = arith.divf %60, %61 : vector<8x1xf32>
    %63 = vector.broadcast %62 : vector<8x1xf32> to vector<8x128xf32>
    %64 = arith.subf %54, %63 : vector<8x128xf32>
    %65 = arith.mulf %64, %64 : vector<8x128xf32>
    %cst_31 = arith.constant dense<0.000000e+00> : vector<8xf32>
    %66 = vector.multi_reduction <add>, %65, %cst_31 [1] : vector<8x128xf32> to vector<8xf32>
    %67 = vector.shape_cast %66 : vector<8xf32> to vector<8x1xf32>
    %cst_32 = arith.constant 1.280000e+02 : f32
    %68 = vector.broadcast %cst_32 : f32 to vector<8x1xf32>
    %69 = arith.divf %67, %68 : vector<8x1xf32>
    %70 = vector.broadcast %62 : vector<8x1xf32> to vector<8x128xf32>
    %71 = arith.subf %54, %70 : vector<8x128xf32>
    %cst_33 = arith.constant 9.99999996E-13 : f32
    %72 = vector.broadcast %cst_33 : f32 to vector<8x1xf32>
    %73 = arith.addf %69, %72 : vector<8x1xf32>
    %74 = math.rsqrt %73 : vector<8x1xf32>
    %75 = vector.broadcast %74 : vector<8x1xf32> to vector<8x128xf32>
    %76 = arith.mulf %71, %75 : vector<8x128xf32>
    %77 = vector.broadcast %56 : vector<1x128xf32> to vector<8x128xf32>
    %78 = arith.mulf %76, %77 : vector<8x128xf32>
    %79 = vector.broadcast %58 : vector<1x128xf32> to vector<8x128xf32>
    %80 = arith.addf %78, %79 : vector<8x128xf32>
    %81 = arith.truncf %80 : vector<8x128xf32> to vector<8x128xbf16>
    %c0_34 = arith.constant 0 : index
    %c0_35 = arith.constant 0 : index
    %c0_36 = arith.constant 0 : index
    %82 = vector.load %arg12[%c0_34, %c0_35, %c0_36] : memref<1x128x256xbf16, #tpu.memory_space<vmem>>, vector<1x128x256xbf16>
    %83 = vector.shape_cast %82 : vector<1x128x256xbf16> to vector<128x256xbf16>
    %cst_37 = arith.constant dense<0.000000e+00> : vector<8x256xf32>
    %84 = tpu.matmul %81, %83, %cst_37 {dimension_numbers = #tpu.dot_dimension_numbers<[1], [0], [0], [1], [0, 0, 1, 1], [], []>} : vector<8x128xbf16>, vector<128x256xbf16>, vector<8x256xf32> -> vector<8x256xf32>
    %c0_38 = arith.constant 0 : index
    %c0_39 = arith.constant 0 : index
    %c0_40 = arith.constant 0 : index
    %85 = vector.load %arg13[%c0_38, %c0_39, %c0_40] : memref<1x1x256xf32, #tpu.memory_space<vmem>>, vector<1x1x256xf32>
    %86 = vector.shape_cast %85 : vector<1x1x256xf32> to vector<1x256xf32>
    %87 = vector.broadcast %86 : vector<1x256xf32> to vector<8x256xf32>
    %88 = arith.addf %84, %87 : vector<8x256xf32>
    %cst_41 = arith.constant 5.000000e-01 : f32
    %89 = vector.broadcast %cst_41 : f32 to vector<8x256xf32>
    %90 = arith.mulf %89, %88 : vector<8x256xf32>
    %cst_42 = arith.constant 4.471500e-02 : f32
    %91 = vector.broadcast %cst_42 : f32 to vector<8x256xf32>
    %92 = arith.mulf %91, %88 : vector<8x256xf32>
    %93 = arith.mulf %92, %88 : vector<8x256xf32>
    %94 = arith.mulf %93, %88 : vector<8x256xf32>
    %95 = arith.addf %88, %94 : vector<8x256xf32>
    %cst_43 = arith.constant 0.797884583 : f32
    %96 = vector.broadcast %cst_43 : f32 to vector<8x256xf32>
    %97 = arith.mulf %96, %95 : vector<8x256xf32>
    %98 = math.tanh %97 : vector<8x256xf32>
    %cst_44 = arith.constant 1.000000e+00 : f32
    %99 = vector.broadcast %cst_44 : f32 to vector<8x256xf32>
    %100 = arith.addf %99, %98 : vector<8x256xf32>
    %101 = arith.mulf %90, %100 : vector<8x256xf32>
    %102 = arith.truncf %101 : vector<8x256xf32> to vector<8x256xbf16>
    %c0_45 = arith.constant 0 : index
    %c0_46 = arith.constant 0 : index
    %c0_47 = arith.constant 0 : index
    %103 = vector.load %arg14[%c0_45, %c0_46, %c0_47] : memref<1x256x128xbf16, #tpu.memory_space<vmem>>, vector<1x256x128xbf16>
    %104 = vector.shape_cast %103 : vector<1x256x128xbf16> to vector<256x128xbf16>
    %cst_48 = arith.constant dense<0.000000e+00> : vector<8x128xf32>
    %105 = tpu.matmul %102, %104, %cst_48 {dimension_numbers = #tpu.dot_dimension_numbers<[1], [0], [0], [1], [0, 0, 1, 1], [], []>} : vector<8x256xbf16>, vector<256x128xbf16>, vector<8x128xf32> -> vector<8x128xf32>
    %c0_49 = arith.constant 0 : index
    %c0_50 = arith.constant 0 : index
    %c0_51 = arith.constant 0 : index
    %106 = vector.load %arg15[%c0_49, %c0_50, %c0_51] : memref<1x1x128xf32, #tpu.memory_space<vmem>>, vector<1x1x128xf32>
    %107 = vector.shape_cast %106 : vector<1x1x128xf32> to vector<1x128xf32>
    %108 = vector.broadcast %107 : vector<1x128xf32> to vector<8x128xf32>
    %109 = arith.addf %105, %108 : vector<8x128xf32>
    %110 = arith.addf %109, %80 : vector<8x128xf32>
    %c0_52 = arith.constant 0 : index
    %c0_53 = arith.constant 0 : index
    %c0_54 = arith.constant 0 : index
    %111 = vector.load %arg16[%c0_52, %c0_53, %c0_54] : memref<1x1x128xf32, #tpu.memory_space<vmem>>, vector<1x1x128xf32>
    %112 = vector.shape_cast %111 : vector<1x1x128xf32> to vector<1x128xf32>
    %c0_55 = arith.constant 0 : index
    %c0_56 = arith.constant 0 : index
    %c0_57 = arith.constant 0 : index
    %113 = vector.load %arg17[%c0_55, %c0_56, %c0_57] : memref<1x1x128xf32, #tpu.memory_space<vmem>>, vector<1x1x128xf32>
    %114 = vector.shape_cast %113 : vector<1x1x128xf32> to vector<1x128xf32>
    %cst_58 = arith.constant dense<0.000000e+00> : vector<8xf32>
    %115 = vector.multi_reduction <add>, %110, %cst_58 [1] : vector<8x128xf32> to vector<8xf32>
    %116 = vector.shape_cast %115 : vector<8xf32> to vector<8x1xf32>
    %cst_59 = arith.constant 1.280000e+02 : f32
    %117 = vector.broadcast %cst_59 : f32 to vector<8x1xf32>
    %118 = arith.divf %116, %117 : vector<8x1xf32>
    %119 = vector.broadcast %118 : vector<8x1xf32> to vector<8x128xf32>
    %120 = arith.subf %110, %119 : vector<8x128xf32>
    %121 = arith.mulf %120, %120 : vector<8x128xf32>
    %cst_60 = arith.constant dense<0.000000e+00> : vector<8xf32>
    %122 = vector.multi_reduction <add>, %121, %cst_60 [1] : vector<8x128xf32> to vector<8xf32>
    %123 = vector.shape_cast %122 : vector<8xf32> to vector<8x1xf32>
    %cst_61 = arith.constant 1.280000e+02 : f32
    %124 = vector.broadcast %cst_61 : f32 to vector<8x1xf32>
    %125 = arith.divf %123, %124 : vector<8x1xf32>
    %126 = vector.broadcast %118 : vector<8x1xf32> to vector<8x128xf32>
    %127 = arith.subf %110, %126 : vector<8x128xf32>
    %cst_62 = arith.constant 9.99999996E-13 : f32
    %128 = vector.broadcast %cst_62 : f32 to vector<8x1xf32>
    %129 = arith.addf %125, %128 : vector<8x1xf32>
    %130 = math.rsqrt %129 : vector<8x1xf32>
    %131 = vector.broadcast %130 : vector<8x1xf32> to vector<8x128xf32>
    %132 = arith.mulf %127, %131 : vector<8x128xf32>
    %133 = vector.broadcast %112 : vector<1x128xf32> to vector<8x128xf32>
    %134 = arith.mulf %132, %133 : vector<8x128xf32>
    %135 = vector.broadcast %114 : vector<1x128xf32> to vector<8x128xf32>
    %136 = arith.addf %134, %135 : vector<8x128xf32>
    %c0_63 = arith.constant 0 : index
    %c0_64 = arith.constant 0 : index
    %137 = vector.load %arg19[%c0_63, %c0_64] : memref<8x128xf32, #tpu.memory_space<vmem>>, vector<8x128xf32>
    tpu.vector_store %arg19[%c0_63, %c0_64], %136 {strides = array<i32>} : memref<8x128xf32, #tpu.memory_space<vmem>>, vector<8x128xf32>,
    %138 = vector.shape_cast %136 : vector<8x128xf32> to vector<1x8x128xf32>
    %c0_65 = arith.constant 0 : index
    %c0_66 = arith.constant 0 : index
    %c0_67 = arith.constant 0 : index
    %139 = vector.load %arg18[%c0_65, %c0_66, %c0_67] : memref<1x8x128xf32, #tpu.memory_space<vmem>>, vector<1x8x128xf32>
    tpu.vector_store %arg18[%c0_65, %c0_66, %c0_67], %138 {strides = array<i32>} : memref<1x8x128xf32, #tpu.memory_space<vmem>>, vector<1x8x128xf32>,
    return
  }
  func.func @transform_0(%arg0: i32, %arg1: i32) -> (i32, i32, i32) {
    %c0_i32 = arith.constant 0 : i32
    %c0_i32_0 = arith.constant 0 : i32
    %c0_i32_1 = arith.constant 0 : i32
    return %arg0, %c0_i32, %c0_i32_0 : i32, i32, i32
  }
  func.func @transform_1(%arg0: i32, %arg1: i32) -> (i32, i32, i32) {
    %c0_i32 = arith.constant 0 : i32
    %c0_i32_0 = arith.constant 0 : i32
    %c0_i32_1 = arith.constant 0 : i32
    return %arg0, %c0_i32, %c0_i32_0 : i32, i32, i32
  }
  func.func @transform_2(%arg0: i32, %arg1: i32) -> (i32, i32) {
    %c0_i32 = arith.constant 0 : i32
    %c0_i32_0 = arith.constant 0 : i32
    %c0_i32_1 = arith.constant 0 : i32
    return %c0_i32, %c0_i32_0 : i32, i32
  }
  func.func @transform_3(%arg0: i32, %arg1: i32) -> (i32, i32) {
    %c0_i32 = arith.constant 0 : i32
    %c0_i32_0 = arith.constant 0 : i32
    %c0_i32_1 = arith.constant 0 : i32
    return %c0_i32, %c0_i32_0 : i32, i32
  }
  func.func @transform_4(%arg0: i32, %arg1: i32) -> (i32, i32, i32) {
    %c0_i32 = arith.constant 0 : i32
    %c0_i32_0 = arith.constant 0 : i32
    %c0_i32_1 = arith.constant 0 : i32
    return %arg1, %c0_i32, %c0_i32_0 : i32, i32, i32
  }
  func.func @transform_5(%arg0: i32, %arg1: i32) -> (i32, i32, i32) {
    %c0_i32 = arith.constant 0 : i32
    %c0_i32_0 = arith.constant 0 : i32
    %c0_i32_1 = arith.constant 0 : i32
    return %arg1, %c0_i32, %c0_i32_0 : i32, i32, i32
  }
  func.func @transform_6(%arg0: i32, %arg1: i32) -> (i32, i32, i32) {
    %c0_i32 = arith.constant 0 : i32
    %c0_i32_0 = arith.constant 0 : i32
    %c0_i32_1 = arith.constant 0 : i32
    return %arg1, %c0_i32, %c0_i32_0 : i32, i32, i32
  }
  func.func @transform_7(%arg0: i32, %arg1: i32) -> (i32, i32, i32) {
    %c0_i32 = arith.constant 0 : i32
    %c0_i32_0 = arith.constant 0 : i32
    %c0_i32_1 = arith.constant 0 : i32
    return %arg1, %c0_i32, %c0_i32_0 : i32, i32, i32
  }
  func.func @transform_8(%arg0: i32, %arg1: i32) -> (i32, i32, i32) {
    %c0_i32 = arith.constant 0 : i32
    %c0_i32_0 = arith.constant 0 : i32
    %c0_i32_1 = arith.constant 0 : i32
    return %arg1, %c0_i32, %c0_i32_0 : i32, i32, i32
  }
  func.func @transform_9(%arg0: i32, %arg1: i32) -> (i32, i32, i32) {
    %c0_i32 = arith.constant 0 : i32
    %c0_i32_0 = arith.constant 0 : i32
    %c0_i32_1 = arith.constant 0 : i32
    return %arg1, %c0_i32, %c0_i32_0 : i32, i32, i32
  }
  func.func @transform_10(%arg0: i32, %arg1: i32) -> (i32, i32, i32) {
    %c0_i32 = arith.constant 0 : i32
    %c0_i32_0 = arith.constant 0 : i32
    %c0_i32_1 = arith.constant 0 : i32
    return %arg1, %c0_i32, %c0_i32_0 : i32, i32, i32
  }
  func.func @transform_11(%arg0: i32, %arg1: i32) -> (i32, i32, i32) {
    %c0_i32 = arith.constant 0 : i32
    %c0_i32_0 = arith.constant 0 : i32
    %c0_i32_1 = arith.constant 0 : i32
    return %arg1, %c0_i32, %c0_i32_0 : i32, i32, i32
  }
  func.func @transform_12(%arg0: i32, %arg1: i32) -> (i32, i32, i32) {
    %c0_i32 = arith.constant 0 : i32
    %c0_i32_0 = arith.constant 0 : i32
    %c0_i32_1 = arith.constant 0 : i32
    return %arg1, %c0_i32, %c0_i32_0 : i32, i32, i32
  }
  func.func @transform_13(%arg0: i32, %arg1: i32) -> (i32, i32, i32) {
    %c0_i32 = arith.constant 0 : i32
    %c0_i32_0 = arith.constant 0 : i32
    %c0_i32_1 = arith.constant 0 : i32
    return %arg1, %c0_i32, %c0_i32_0 : i32, i32, i32
  }
  func.func @transform_14(%arg0: i32, %arg1: i32) -> (i32, i32, i32) {
    %c0_i32 = arith.constant 0 : i32
    %c0_i32_0 = arith.constant 0 : i32
    %c0_i32_1 = arith.constant 0 : i32
    return %arg1, %c0_i32, %c0_i32_0 : i32, i32, i32
  }
  func.func @transform_15(%arg0: i32, %arg1: i32) -> (i32, i32, i32) {
    %c0_i32 = arith.constant 0 : i32
    %c0_i32_0 = arith.constant 0 : i32
    %c0_i32_1 = arith.constant 0 : i32
    return %arg1, %c0_i32, %c0_i32_0 : i32, i32, i32
  }
  func.func @transform_16(%arg0: i32, %arg1: i32) -> (i32, i32, i32) {
    %c0_i32 = arith.constant 0 : i32
    %c0_i32_0 = arith.constant 0 : i32
    %c0_i32_1 = arith.constant 0 : i32
    return %arg0, %c0_i32, %c0_i32_0 : i32, i32, i32
  }
}

</mosaic_0001>

<bundles_post_ra>
// kernel: tpu_custom_call.1
= control target key start
LH: loop header
LB: loop body
LE: loop exit
PB: predicated region body
PF: predicated region fallthrough
CT: control target
= control target key end

     0   :  { %s5009_s0 = inlined_call_operand.hbm [shape: f32[2,8,128], index: 0, kind: input, shape index: {}]   ;;  %s5010_s1 = inlined_call_operand.hbm [shape: f32[2,1,8], index: 1, kind: input, shape index: {}]   ;;  %s5011_s2 = inlined_call_operand.hbm [shape: f32[1,128], index: 2, kind: input, shape index: {}]   ;;  %s5012_s3 = inlined_call_operand.hbm [shape: f32[1,128], index: 3, kind: input, shape index: {}]   ;;  %s5013_s4 = inlined_call_operand.hbm [shape: bf16[2,128,384], index: 4, kind: input, shape index: {}]   ;;  %s5014_s5 = inlined_call_operand.vmem [shape: f32[2,1,384], index: 5, kind: input, shape index: {}]   ;;  %s5015_s6 = inlined_call_operand.hbm [shape: bf16[2,128,128], index: 6, kind: input, shape index: {}]   ;;  %s5016_s7 = inlined_call_operand.vmem [shape: f32[2,1,128], index: 7, kind: input, shape index: {}]   ;;  %s5017_s8 = inlined_call_operand.vmem [shape: f32[2,1,128], index: 8, kind: input, shape index: {}]   ;;  %s5018_s9 = inlined_call_operand.vmem [shape: f32[2,1,128], index: 9, kind: input, shape index: {}]   ;;  %s5019_s10 = inlined_call_operand.hbm [shape: bf16[2,128,256], index: 10, kind: input, shape index: {}]   ;;  %s5020_s11 = inlined_call_operand.vmem [shape: f32[2,1,256], index: 11, kind: input, shape index: {}]   ;;  %s5021_s12 = inlined_call_operand.hbm [shape: bf16[2,256,128], index: 12, kind: input, shape index: {}]   ;;  %s5022_s13 = inlined_call_operand.vmem [shape: f32[2,1,128], index: 13, kind: input, shape index: {}]   ;;  %s5023_s14 = inlined_call_operand.vmem [shape: f32[2,1,128], index: 14, kind: input, shape index: {}]   ;;  %s5024_s15 = inlined_call_operand.vmem [shape: f32[2,1,128], index: 15, kind: input, shape index: {}]   ;;  %s5025_s16 = inlined_call_operand.hbm [shape: f32[2,8,128], index: 16, kind: output, shape index: {}]  }
   0x1   :  { %5059 = sst [smem:[#allocation41_spill]] %s5009_s0 }
   0x2   :  { %5060 = sst [smem:[#allocation42_spill]] %s5010_s1 }
   0x3   :  { %5061 = sst [smem:[#allocation43_spill]] %s5011_s2 }
   0x4   :  { %5062 = sst [smem:[#allocation44_spill]] %s5012_s3 }
   0x5   :  { %5063 = sst [smem:[#allocation45_spill]] %s5013_s4 }
   0x6   :  { %5064 = sst [smem:[#allocation46_spill]] %s5014_s5 }
   0x7   :  { %5065 = sst [smem:[#allocation47_spill]] %s5015_s6 }
   0x8   :  { %5066 = sst [smem:[#allocation48_spill]] %s5016_s7 }
   0x9   :  { %5067 = sst [smem:[#allocation49_spill]] %s5017_s8 }
   0xa   :  { %5068 = sst [smem:[#allocation50_spill]] %s5018_s9 }
   0xb   :  { %5069 = sst [smem:[#allocation51_spill]] %s5019_s10 }
   0xc   :  { %5070 = sst [smem:[#allocation52_spill]] %s5020_s11 }
   0xd   :  { %5071 = sst [smem:[#allocation53_spill]] %s5021_s12 }
   0xe   :  { %5072 = sst [smem:[#allocation54_spill]] %s5022_s13 }
   0xf   :  { %5073 = sst [smem:[#allocation55_spill]] %s5023_s14 }
  0x10   :  { %5074 = sst [smem:[#allocation56_spill]] %s5024_s15 }
  0x11   :  { %5075 = sst [smem:[#allocation57_spill]] %s5025_s16 }
  0x12   :  { %21 = vsyncpa [#allocation4], 0 }
  0x13   :  { %23 = vsyncpa [#allocation4 + $0x1], 0 }
  0x14   :  { %24 = vsyncpa [#allocation7], 0 }
  0x15   :  { %26 = vsyncpa [#allocation7 + $0x1], 0 }
  0x16   :  { %27 = vsyncpa [#allocation10], 0 }
  0x17   :  { %28 = vsyncpa [#allocation5], 0 }
  0x18   :  { %30 = vsyncpa [#allocation5 + $0x1], 0  ;;  %s4102_s21 = smov 0   ;;  %s4104_s22 = smov 0  }
  0x19   :  { %s4106_s23 = smov 0   ;;  %s4108_s24 = smov 0  }
  0x1a   :  { %s4110_s25 = smov 0   ;;  %s4112_s26 = smov 0  }
  0x1b   :  { %s4114_s27 = smov 0   ;;  %s4116_s28 = smov 0  }
  0x1c   :  { %s4118_s29 = smov 0   ;;  %s4120_s30 = smov 0  }
  0x1d   :  { %s4122_s0 = smov 0  }
  0x1e LB: > { %5076 = sst [smem:[#allocation25_spill]] %s3956_s22  ;;  %s4156_s17 = sadd.s32 4294967295, %s3992_s0   ;;  %s3992_s0 = sphi %s4122_s0, %s36_s0   ;;  %s3988_s30 = sphi %s4120_s30, %s5165_s30   ;;  %s3984_s29 = sphi %s4118_s29, %s5164_s29   ;;  %s3980_s28 = sphi %s4116_s28, %s5163_s28   ;;  %s3976_s27 = sphi %s4114_s27, %s5162_s27   ;;  %s3972_s26 = sphi %s4112_s26, %s5161_s26   ;;  %s3968_s25 = sphi %s4110_s25, %s5160_s25   ;;  %s3964_s24 = sphi %s4108_s24, %s5159_s24   ;;  %s3960_s23 = sphi %s4106_s23, %s5158_s23   ;;  %s3956_s22 = sphi %s4104_s22, %s5157_s22   ;;  %s3952_s21 = sphi %s4102_s21, %s5156_s21  }
  0x1f   : > { %5077 = sst [smem:[#allocation26_spill]] %s3960_s23  ;;  %p162_p0 = scmp.ne.s32.totalorder %s3956_s22, %s3952_s21 }
  0x20   : > { %5078 = sst [smem:[#allocation27_spill]] %s3964_s24  ;;  %p5028_p1 = scmp.eq.s32.totalorder %s4156_s17, 0 }
  0x21   : > { %5079 = sst [smem:[#allocation28_spill]] %s3968_s25  ;;  %p3073_p3 = scmp.ge.s32.totalorder %s3992_s0, 1 }
  0x22   : > { %5080 = sst [smem:[#allocation29_spill]] %s3972_s26  ;;  %p485_p4 = scmp.lt.s32.totalorder %s3992_s0, 5 }
  0x23   : > { %5081 = sst [smem:[#allocation30_spill]] %s3976_s27  ;;  %p4165_p5 = por %p162_p0, %p5028_p1 }
  0x24   : > { %5082 = sst [smem:[#allocation31_spill]] %s3980_s28  ;;  %p4169_p6 = pnand %p3073_p3, %p485_p4 }
  0x25   : > { %5083 = sst [smem:[#allocation32_spill]] %s3984_s29  ;;  %s3994_s20 = smov [#allocation8]  }
  0x26   : > { %5084 = sst [smem:[#allocation33_spill]] %s3988_s30  ;;  %s498_s16 = sshll.u32 %s3994_s20, 4  ;;  %s499_s16 = int_to_ptr.vmem [resolvable:$true] %s498_s16 }
  0x27   : > { %s5085_s18 = scalar_select %p4165_p5, 1, 0 }
  0x28   : > { %s5087_s19 = scalar_select %p4169_p6, 1, 0 }
  0x29   : > { %5086 = sst [smem:[#allocation34_spill]] %s5085_s18  ;;  %p3360_p7 = pneg %p4169_p6 }
  0x2a   : > { %s5089_s2 = sld [smem:[#allocation43_spill]] }
  0x2b   : > { %p4177_p8 = pnand %p3360_p7, %p5028_p1 }
  0x2d   : > { %s5088_s21 = scalar_select %p4177_p8, 1, 0 }
  0x2e   : > { %p5032_p10 = pneg %p4177_p8 }
  0x30   : > { %s3606_s14 = scalar_lea.hbm %s5089_s2, 16 }
  0x31   : > { %p3607_p9 = scmp.ne.s32.totalorder %s5089_s2, %s3606_s14  ;;  %p3613_p13 = scmp.lt.u32.totalorder %s3606_s14, %s5089_s2 }
  0x33   : > { %p3609_p11 = pnand %p5032_p10, %p3607_p9 }
  0x35   : > { %p3610_p12 = pneg %p3609_p11 }
  0x37   : > { %p3615_p0 = pnand %p3613_p13, %p3610_p12 }
  0x39   : > { %3618 = shalt.err (!%p3615_p0)
}
  0x3a   : > { %s3619_s15 = scalar_lea.vmem %s499_s16, 16  ;;  %s3626_s11 = scalar_lea.vmem %s499_s16, 32 }
  0x3b   : > { %p3620_p3 = scmp.ne.s32.totalorder %s499_s16, %s3619_s15  ;;  %p3627_p2 = scmp.lt.s32.totalorder %s499_s16, %s499_s16 }
  0x3c   : > { %p3628_p1 = scmp.lt.s32.totalorder %s3626_s11, %s3619_s15 }
  0x3d   : > { %p3622_p4 = pnand %p3620_p3, %p5032_p10 }
  0x3e   : > { %p3629_p5 = por %p3628_p1, %p3627_p2 }
  0x3f   : > { %p3623_p7 = pneg %p3622_p4 }
  0x41   : > { %p3630_p6 = pnand %p3629_p5, %p3623_p7 }
  0x43   : > { %3633 = shalt.err (!%p3630_p6)
}
  0x44   : > { %3363 = dma.hbm_to_vmem [thread:$0]  (!%p4177_p8), %s5089_s2, 16, %s499_s16, [#allocation7]  }
  0x45   : > { %s3072_s14 = sadd.s32 4294967294, %s3992_s0   ;;  %s45_s28 = sadd.s32 1, %s3984_s29 }
  0x46   : > { %p46_p1 = scmp.ge.s32.totalorder %s45_s28, 2  ;;  %s48_s20 = sadd.s32 1, %s3988_s30 }
  0x47   : > { %s55_s15 = sadd.s32 1, %s3972_s26  ;;  %p62_p2 = scmp.ne.s32.totalorder %s3972_s26, %s3968_s25 }
  0x48   : > { %s5167_s28 = smov (%p46_p1, %s45_s28), 0  ;;  %s5169_s20 = smov (!%p46_p1, %s48_s20), %s3988_s30 }
  0x49   : > { %5090 = sst [smem:[#allocation35_spill]] %s5167_s28  ;;  %p63_p5 = scmp.eq.s32.totalorder %s3992_s0, 0 }
  0x4a   : > { %p68_p6 = scmp.ne.s32.totalorder %s3968_s25, %s3964_s24  ;;  %p50_p9 = scmp.ge.s32.totalorder %s5169_s20, 2 }
  0x4b   : > { %s146_s16 = ssub.s32 %s3984_s29, %s5167_s28  ;;  %p4222_p11 = por %p63_p5, %p62_p2 }
  0x4c   : > { %p5092_p12 = scmp.eq.s32.totalorder %s4156_s17, 0  ;;  %s5171_s20 = smov (%p50_p9, %s5169_s20), 0 }
  0x4d   : > { %5094 = sst [smem:[#allocation36_spill]] %s5171_s20  ;;  %p147_p0 = scmp.eq.s32.totalorder %s146_s16, 0 }
  0x4e   : > { %p4231_p13 = por %p5092_p12, %p68_p6  ;;  %s149_s5 = sadd.s32 1, %s3960_s23 }
  0x4f   : > { %s52_s2 = ssub.s32 %s3988_s30, %s5171_s20  ;;  %p156_p3 = scmp.ne.s32.totalorder %s3960_s23, %s3956_s22 }
  0x50   : > { %s5093_s13 = scalar_select %p4231_p13, 1, 0 }
  0x51   : > { %p53_p4 = scmp.eq.s32.totalorder %s52_s2, 0  ;;  %p5095_p7 = scmp.eq.s32.totalorder %s4156_s17, 3 }
  0x52   : > { %s4252_s9 = scalar_select %p147_p0, %s3960_s23, %s149_s5  }
  0x53   : > { %p4247_p1 = por %p5095_p7, %p62_p2  ;;  %p4259_p9 = por %p156_p3, %p63_p5 }
  0x54   : > { %5098 = sst [smem:[#allocation38_spill]] %s4252_s9  ;;  %p478_p12 = scmp.eq.s32.totalorder %s3072_s14, 3 }
  0x55   : > { %s5096_s28 = scalar_select %p4247_p1, 1, 0 }
  0x56   : > { %s4255_s8 = scalar_select %p53_p4, %s3972_s26, %s55_s15  }
  0x57   : > { %5097 = sst [smem:[#allocation37_spill]] %s5096_s28  ;;  %p5043_p10 = scmp.lt.s32.totalorder %s3992_s0, 4 }
  0x58   : > { %5099 = sst [smem:[#allocation39_spill]] %s4255_s8  ;;  %p4268_p13 = por %p478_p12, %p68_p6 }
  0x59   : > { %s5039_s7 = sand.u32 1, %s3972_s26   ;;  %s3078_s28 = sshll.u32 %s3988_s30, 7 }
  0x5a   : > { %s5101_s2 = scalar_select %p4268_p13, 1, 0 }
  0x5b   : > { %s3077_s5 = sshll.u32 %s5039_s7, 3  ;;  %s5103_s8 = sld [smem:[#allocation41_spill]] }
  0x5c   : > { %5102 = sst [smem:[#allocation40_spill]] %s5101_s2  ;;  %p4285_p2 = pnand %p5043_p10, %p4222_p11 }
  0x5d   : > { %s524_s20 = scalar_lea.vmem [#allocation3], %s3077_s5  ;;  %s5105_s7 = sand.u32 1, %s3992_s0  }
  0x5e   : > { %s531_s2 = sshll.u32 %s524_s20, 4  ;;  %s4293_s9 = scalar_lea.sflag [#allocation4], %s5105_s7  ;;  %s4289_s2 = int_to_ptr.vmem [resolvable:$true] %s531_s2 }
  0x5f   : > { %p3636_p6 = pneg %p4285_p2 }
  0x61   : > { %s4279_s27 = scalar_lea.hbm %s5103_s8, %s3078_s28  ;;  %s3639_s24 = scalar_lea.hbm %s5103_s8, 256 }
  0x62   : > { %s3634_s28 = scalar_lea.hbm %s4279_s27, 128  ;;  %p3640_p3 = scmp.lt.u32.totalorder %s4279_s27, %s5103_s8 }
  0x63   : > { %p3635_p5 = scmp.ne.s32.totalorder %s4279_s27, %s3634_s28  ;;  %p3641_p4 = scmp.lt.u32.totalorder %s3639_s24, %s3634_s28 }
  0x64   : > { %p3643_p12 = scmp.lt.u32.totalorder %s3634_s28, %s4279_s27 }
  0x65   : > { %p3637_p0 = pnand %p3636_p6, %p3635_p5  ;;  %p3642_p7 = por %p3641_p4, %p3640_p3 }
  0x67   : > { %p3638_p11 = pneg %p3637_p0  ;;  %p3644_p10 = por %p3643_p12, %p3642_p7 }
  0x69   : > { %p3645_p13 = pnand %p3644_p10, %p3638_p11 }
  0x6b   : > { %3648 = shalt.err (!%p3645_p13)
}
  0x6c   : > { %s3649_s7 = scalar_lea.vmem %s4289_s2, 128  ;;  %s3995_s20 = smov [#allocation3]  }
  0x6d   : > { %p3650_p5 = scmp.ne.s32.totalorder %s4289_s2, %s3649_s7  ;;  %s3654_s11 = sshll.u32 %s3995_s20, 4  ;;  %s3655_s11 = int_to_ptr.vmem [resolvable:$false] %s3654_s11 }
  0x6e   : > { %s3656_s18 = scalar_lea.vmem %s3655_s11, 256  ;;  %p3657_p8 = scmp.lt.s32.totalorder %s4289_s2, %s3655_s11 }
  0x6f   : > { %p3652_p0 = pnand %p3650_p5, %p3636_p6  ;;  %p3658_p3 = scmp.lt.s32.totalorder %s3656_s18, %s3649_s7 }
  0x71   : > { %p3653_p1 = pneg %p3652_p0  ;;  %p3659_p4 = por %p3658_p3, %p3657_p8 }
  0x73   : > { %p3660_p7 = pnand %p3659_p4, %p3653_p1 }
  0x75   : > { %3663 = shalt.err (!%p3660_p7)
}
  0x76   : > { %3370 = dma.hbm_to_vmem [thread:$0]  (!%p4285_p2), %s4279_s27, 128, %s4289_s2, %s4293_s9  }
  0x77   : > { %p5106_p10 = scmp.lt.s32.totalorder %s3992_s0, 4  ;;  %s3079_s28 = sshll.u32 %s3988_s30, 4 }
  0x78   : > { %s5108_s15 = sand.u32 1, %s3972_s26   ;;  %s5109_s1 = sld [smem:[#allocation42_spill]] }
  0x79   : > { %p4325_p13 = pnand %p5106_p10, %p4259_p9  ;;  %s541_s5 = scalar_lea.vmem [#allocation6], %s5108_s15 }
  0x7a   : > { %s548_s7 = sshll.u32 %s541_s5, 4  ;;  %s4340_s27 = sand.u32 1, %s3960_s23   ;;  %s4337_s7 = int_to_ptr.vmem [resolvable:$true] %s548_s7 }
  0x7b   : > { %s5107_s24 = scalar_select %p4325_p13, 1, 0 }
  0x7c   : > { %s5110_s16 = sand.u32 1, %s3992_s0  }
  0x7d   : > { %s4344_s2 = scalar_lea.sflag [#allocation7], %s5110_s16 }
  0x7e   : > { %s4335_s18 = scalar_lea.hbm %s5109_s1, %s3079_s28  ;;  %s3669_s5 = scalar_lea.hbm %s5109_s1, 32 }
  0x7f   : > { %s3664_s8 = scalar_lea.hbm %s4335_s18, 16  ;;  %p3670_p11 = scmp.lt.u32.totalorder %s4335_s18, %s5109_s1 }
  0x80   : > { %p3665_p8 = scmp.ne.s32.totalorder %s4335_s18, %s3664_s8  ;;  %p3671_p12 = scmp.lt.u32.totalorder %s3669_s5, %s3664_s8 }
  0x81   : > { %p3673_p0 = scmp.lt.u32.totalorder %s3664_s8, %s4335_s18 }
  0x82   : > { %p3667_p1 = pnand %p3665_p8, %p3636_p6  ;;  %p3672_p5 = por %p3671_p12, %p3670_p11 }
  0x84   : > { %p3668_p9 = pneg %p3667_p1  ;;  %p3674_p3 = por %p3673_p0, %p3672_p5 }
  0x86   : > { %p3675_p4 = pnand %p3674_p3, %p3668_p9 }
  0x88   : > { %3678 = shalt.err (!%p3675_p4)
}
  0x89   : > { %s3679_s16 = scalar_lea.vmem %s4337_s7, 16  ;;  %s3996_s15 = smov [#allocation6]  }
  0x8a   : > { %p3680_p7 = scmp.ne.s32.totalorder %s4337_s7, %s3679_s16  ;;  %s3684_s28 = sshll.u32 %s3996_s15, 4  ;;  %s3685_s28 = int_to_ptr.vmem [resolvable:$false] %s3684_s28 }
  0x8b   : > { %s3686_s20 = scalar_lea.vmem %s3685_s28, 32  ;;  %p3687_p1 = scmp.lt.s32.totalorder %s4337_s7, %s3685_s28 }
  0x8c   : > { %p3682_p10 = pnand %p3680_p7, %p3636_p6  ;;  %p3688_p11 = scmp.lt.s32.totalorder %s3686_s20, %s3679_s16 }
  0x8e   : > { %p3683_p8 = pneg %p3682_p10  ;;  %p3689_p12 = por %p3688_p11, %p3687_p1 }
  0x90   : > { %p3690_p5 = pnand %p3689_p12, %p3683_p8 }
  0x92   : > { %3693 = shalt.err (!%p3690_p5)
}
  0x93   : > { %3373 = dma.hbm_to_vmem [thread:$0]  (!%p4285_p2), %s4335_s18, 16, %s4337_s7, %s4344_s2  }
  0x94   : > { %s3334_s8 = smul.u32 192, %s4340_s27  ;;  %s3081_s11 = sshll.u32 %s4340_s27, 6 }
  0x95   : > { %s3335_s5 = smul.u32 3072, %s3984_s29  ;;  %s5111_s4 = sld [smem:[#allocation45_spill]] }
  0x96   : > { %s559_s14 = scalar_lea.vmem [#allocation11], %s3334_s8  ;;  %p4384_p2 = pneg %p4325_p13 }
  0x97   : > { %s566_s28 = sshll.u32 %s559_s14, 4  ;;  %s4378_s28 = int_to_ptr.vmem [resolvable:$true] %s566_s28 }
  0x98   : > { %s5112_s7 = scalar_select %p4384_p2, 1, 0 }
  0x9b   : > { %s4376_s16 = scalar_lea.hbm %s5111_s4, %s3335_s5  ;;  %s3699_s5 = scalar_lea.hbm %s5111_s4, 6144 }
  0x9c   : > { %s3694_s20 = scalar_lea.hbm %s4376_s16, 3072  ;;  %p3700_p3 = scmp.lt.u32.totalorder %s4376_s16, %s5111_s4 }
  0x9d   : > { %p3695_p6 = scmp.ne.s32.totalorder %s4376_s16, %s3694_s20  ;;  %p3701_p4 = scmp.lt.u32.totalorder %s3699_s5, %s3694_s20 }
  0x9e   : > { %p3703_p10 = scmp.lt.u32.totalorder %s3694_s20, %s4376_s16 }
  0x9f   : > { %p3697_p9 = pnand %p4384_p2, %p3695_p6  ;;  %p3702_p7 = por %p3701_p4, %p3700_p3 }
  0xa1   : > { %p3698_p0 = pneg %p3697_p9  ;;  %p3704_p8 = por %p3703_p10, %p3702_p7 }
  0xa3   : > { %p3705_p1 = pnand %p3704_p8, %p3698_p0 }
  0xa5   : > { %3708 = shalt.err (!%p3705_p1)
}
  0xa6   : > { %s3709_s14 = scalar_lea.vmem %s4378_s28, 3072  ;;  %s3997_s1 = smov [#allocation11]  }
  0xa7   : > { %p3710_p11 = scmp.ne.s32.totalorder %s4378_s28, %s3709_s14  ;;  %s3714_s18 = sshll.u32 %s3997_s1, 4  ;;  %s3715_s18 = int_to_ptr.vmem [resolvable:$false] %s3714_s18 }
  0xa8   : > { %s3716_s15 = scalar_lea.vmem %s3715_s18, 6144  ;;  %p3717_p6 = scmp.lt.s32.totalorder %s4378_s28, %s3715_s18 }
  0xa9   : > { %p3712_p12 = pnand %p3710_p11, %p4384_p2  ;;  %p3718_p9 = scmp.lt.s32.totalorder %s3716_s15, %s3709_s14 }
  0xab   : > { %p3713_p5 = pneg %p3712_p12  ;;  %p3719_p3 = por %p3718_p9, %p3717_p6 }
  0xad   : > { %p3720_p4 = pnand %p3719_p3, %p3713_p5 }
  0xaf   : > { %3723 = shalt.err (!%p3720_p4)
}
  0xb0   : > { %s3998_s20 = smov 192   ;;  %s3999_s5 = smov 12  }
  0xb1   : > { %3376 = dma.hbm_to_vmem [thread:$0]  (!%p4325_p13), %s4376_s16, 3072, %s4378_s28, %s4293_s9, %s3998_s20, %s3998_s20, %s3999_s5  }
  0xb2   : > { %s3187_s8 = sshll.u32 %s3984_s29, 10  ;;  %s587_s1 = scalar_lea.vmem [#allocation12], %s3081_s11 }
  0xb3   : > { %s594_s4 = sshll.u32 %s587_s1, 4  ;;  %s5113_s6 = sld [smem:[#allocation47_spill]]  ;;  %s4416_s4 = int_to_ptr.vmem [resolvable:$true] %s594_s4 }
  0xb9   : > { %s4414_s15 = scalar_lea.hbm %s5113_s6, %s3187_s8  ;;  %s3729_s11 = scalar_lea.hbm %s5113_s6, 2048 }
  0xba   : > { %s3724_s30 = scalar_lea.hbm %s4414_s15, 1024  ;;  %p3730_p8 = scmp.lt.u32.totalorder %s4414_s15, %s5113_s6 }
  0xbb   : > { %p3725_p0 = scmp.ne.s32.totalorder %s4414_s15, %s3724_s30  ;;  %p3731_p1 = scmp.lt.u32.totalorder %s3729_s11, %s3724_s30 }
  0xbc   : > { %p3733_p12 = scmp.lt.u32.totalorder %s3724_s30, %s4414_s15 }
  0xbd   : > { %p3727_p7 = pnand %p3725_p0, %p4384_p2  ;;  %p3732_p11 = por %p3731_p1, %p3730_p8 }
  0xbf   : > { %p3728_p10 = pneg %p3727_p7  ;;  %p3734_p5 = por %p3733_p12, %p3732_p11 }
  0xc1   : > { %p3735_p6 = pnand %p3734_p5, %p3728_p10 }
  0xc3   : > { %3738 = shalt.err (!%p3735_p6)
}
  0xc4   : > { %s3739_s8 = scalar_lea.vmem %s4416_s4, 1024  ;;  %s4000_s1 = smov [#allocation12]  }
  0xc5   : > { %p3740_p9 = scmp.ne.s32.totalorder %s4416_s4, %s3739_s8  ;;  %s3744_s18 = sshll.u32 %s4000_s1, 4  ;;  %s3745_s18 = int_to_ptr.vmem [resolvable:$false] %s3744_s18 }
  0xc6   : > { %s3746_s14 = scalar_lea.vmem %s3745_s18, 2048  ;;  %p3747_p0 = scmp.lt.s32.totalorder %s4416_s4, %s3745_s18 }
  0xc7   : > { %p3742_p3 = pnand %p3740_p9, %p4384_p2  ;;  %p3748_p7 = scmp.lt.s32.totalorder %s3746_s14, %s3739_s8 }
  0xc9   : > { %p3743_p4 = pneg %p3742_p3  ;;  %p3749_p8 = por %p3748_p7, %p3747_p0 }
  0xcb   : > { %p3750_p1 = pnand %p3749_p8, %p3743_p4 }
  0xcd   : > { %3753 = shalt.err (!%p3750_p1)
}
  0xce   : > { %s4001_s30 = smov 64   ;;  %s4002_s16 = smov 4  }
  0xcf   : > { %3379 = dma.hbm_to_vmem [thread:$0]  (!%p4325_p13), %s4414_s15, 1024, %s4416_s4, %s4344_s2, %s4001_s30, %s4001_s30, %s4002_s16  }
  0xd0   : > { %s3084_s28 = sshll.u32 %s4340_s27, 7  ;;  %s4003_s11 = smov [#allocation9]  }
  0xd1   : > { %s509_s20 = sshll.u32 %s4003_s11, 4  ;;  %s3188_s5 = sshll.u32 %s3984_s29, 11  ;;  %s510_s20 = int_to_ptr.vmem [resolvable:$true] %s509_s20 }
  0xd2   : > { %s5114_s3 = sld [smem:[#allocation44_spill]]  ;;  %p5115_p11 = scmp.ne.s32.totalorder %s5088_s21, 0 }
  0xd4   : > { %p5116_p12 = pneg %p5115_p11 }
  0xd8   : > { %s3754_s18 = scalar_lea.hbm %s5114_s3, 16 }
  0xd9   : > { %p3755_p10 = scmp.ne.s32.totalorder %s5114_s3, %s3754_s18  ;;  %p3761_p9 = scmp.lt.u32.totalorder %s3754_s18, %s5114_s3 }
  0xdb   : > { %p3757_p5 = pnand %p3755_p10, %p5116_p12 }
  0xdd   : > { %p3758_p6 = pneg %p3757_p5 }
  0xdf   : > { %p3763_p3 = pnand %p3761_p9, %p3758_p6 }
  0xe1   : > { %3766 = shalt.err (!%p3763_p3)
}
  0xe2   : > { %s3767_s4 = scalar_lea.vmem %s510_s20, 16  ;;  %p5117_p0 = pmov %p5116_p12 }
  0xe3   : > { %p3768_p4 = scmp.ne.s32.totalorder %s510_s20, %s3767_s4  ;;  %s3774_s15 = scalar_lea.vmem %s510_s20, 32 }
  0xe4   : > { %p3775_p1 = scmp.lt.s32.totalorder %s510_s20, %s510_s20  ;;  %p3776_p13 = scmp.lt.s32.totalorder %s3774_s15, %s3767_s4 }
  0xe5   : > { %p3770_p7 = pnand %p3768_p4, %p5117_p0 }
  0xe6   : > { %p3777_p2 = por %p3776_p13, %p3775_p1 }
  0xe7   : > { %p3771_p8 = pneg %p3770_p7 }
  0xe9   : > { %p3778_p10 = pnand %p3777_p2, %p3771_p8 }
  0xeb   : > { %3781 = shalt.err (!%p3778_p10)
}
  0xec   : > { %3366 = dma.hbm_to_vmem [thread:$0]  (!%p5115_p11), %s5114_s3, 16, %s510_s20, [#allocation10]  }
  0xed   : > { %s5118_s10 = sld [smem:[#allocation51_spill]]  ;;  %s626_s1 = scalar_lea.vmem [#allocation13], %s3084_s28 }
  0xee   : > { %s633_s21 = sshll.u32 %s626_s1, 4  ;;  %p5119_p2 = scmp.ne.s32.totalorder %s5112_s7, 0  ;;  %s4474_s21 = int_to_ptr.vmem [resolvable:$true] %s633_s21 }
  0xf3   : > { %s4470_s8 = scalar_lea.hbm %s5118_s10, %s3188_s5  ;;  %s3787_s4 = scalar_lea.hbm %s5118_s10, 4096 }
  0xf4   : > { %s3782_s18 = scalar_lea.hbm %s4470_s8, 2048  ;;  %p3788_p5 = scmp.lt.u32.totalorder %s4470_s8, %s5118_s10 }
  0xf5   : > { %p3783_p13 = scmp.ne.s32.totalorder %s4470_s8, %s3782_s18  ;;  %p3789_p6 = scmp.lt.u32.totalorder %s3787_s4, %s3782_s18 }
  0xf6   : > { %p3791_p3 = scmp.lt.u32.totalorder %s3782_s18, %s4470_s8 }
  0xf7   : > { %p3785_p12 = pnand %p3783_p13, %p5119_p2  ;;  %p3790_p9 = por %p3789_p6, %p3788_p5 }
  0xf9   : > { %p3786_p11 = pneg %p3785_p12  ;;  %p3792_p4 = por %p3791_p3, %p3790_p9 }
  0xfb   : > { %p3793_p0 = pnand %p3792_p4, %p3786_p11 }
  0xfd   : > { %3796 = shalt.err (!%p3793_p0)
}
  0xfe   : > { %s3797_s23 = scalar_lea.vmem %s4474_s21, 2048  ;;  %s4004_s26 = smov [#allocation13]  }
  0xff   : > { %p3798_p7 = scmp.ne.s32.totalorder %s4474_s21, %s3797_s23  ;;  %s3802_s11 = sshll.u32 %s4004_s26, 4  ;;  %s3803_s11 = int_to_ptr.vmem [resolvable:$false] %s3802_s11 }
 0x100   : > { %s3804_s1 = scalar_lea.vmem %s3803_s11, 4096  ;;  %p3805_p10 = scmp.lt.s32.totalorder %s4474_s21, %s3803_s11 }
 0x101   : > { %p3800_p8 = pnand %p3798_p7, %p5119_p2  ;;  %p3806_p13 = scmp.lt.s32.totalorder %s3804_s1, %s3797_s23 }
 0x103   : > { %p3801_p1 = pneg %p3800_p8  ;;  %p3807_p12 = por %p3806_p13, %p3805_p10 }
 0x105   : > { %p3808_p5 = pnand %p3807_p12, %p3801_p1 }
 0x107   : > { %3811 = shalt.err (!%p3808_p5)
}
 0x108   : > { %s4005_s18 = smov 128   ;;  %s4006_s20 = smov 8  }
 0x109   : > { %p5120_p11 = scmp.ne.s32.totalorder %s5107_s24, 0  ;;  %s5121_s12 = sld [smem:[#allocation53_spill]] }
 0x10a   : > { %s654_s6 = scalar_lea.vmem [#allocation14], %s3084_s28 }
 0x10b   : > { %3382 = dma.hbm_to_vmem [thread:$0]  (!%p5120_p11), %s4470_s8, 2048, %s4474_s21, %s4293_s9, %s4005_s18, %s4005_s18, %s4006_s20  }
 0x10c   : > { %s661_s23 = sshll.u32 %s654_s6, 4  ;;  %s4507_s23 = int_to_ptr.vmem [resolvable:$true] %s661_s23 }
 0x10f   : > { %s4503_s15 = scalar_lea.hbm %s5121_s12, %s3188_s5  ;;  %s3817_s21 = scalar_lea.hbm %s5121_s12, 4096 }
 0x110   : > { %s3812_s26 = scalar_lea.hbm %s4503_s15, 2048  ;;  %p3818_p4 = scmp.lt.u32.totalorder %s4503_s15, %s5121_s12 }
 0x111   : > { %p3813_p6 = scmp.ne.s32.totalorder %s4503_s15, %s3812_s26  ;;  %p3819_p0 = scmp.lt.u32.totalorder %s3817_s21, %s3812_s26 }
 0x112   : > { %p3821_p8 = scmp.lt.u32.totalorder %s3812_s26, %s4503_s15 }
 0x113   : > { %p3815_p9 = pnand %p3813_p6, %p5119_p2  ;;  %p3820_p7 = por %p3819_p0, %p3818_p4 }
 0x115   : > { %p3816_p3 = pneg %p3815_p9  ;;  %p3822_p1 = por %p3821_p8, %p3820_p7 }
 0x117   : > { %p3823_p10 = pnand %p3822_p1, %p3816_p3 }
 0x119   : > { %3826 = shalt.err (!%p3823_p10)
}
 0x11a   : > { %s3827_s27 = scalar_lea.vmem %s4507_s23, 2048  ;;  %s4007_s28 = smov [#allocation14]  }
 0x11b   : > { %p3828_p13 = scmp.ne.s32.totalorder %s4507_s23, %s3827_s27  ;;  %s3832_s1 = sshll.u32 %s4007_s28, 4  ;;  %s3833_s1 = int_to_ptr.vmem [resolvable:$false] %s3832_s1 }
 0x11c   : > { %s3834_s18 = scalar_lea.vmem %s3833_s1, 4096  ;;  %p3835_p6 = scmp.lt.s32.totalorder %s4507_s23, %s3833_s1 }
 0x11d   : > { %p3830_p12 = pnand %p3828_p13, %p5119_p2  ;;  %p3836_p9 = scmp.lt.s32.totalorder %s3834_s18, %s3827_s27 }
 0x11f   : > { %p3831_p5 = pneg %p3830_p12  ;;  %p3837_p4 = por %p3836_p9, %p3835_p6 }
 0x121   : > { %p3838_p0 = pnand %p3837_p4, %p3831_p5 }
 0x123   : > { %3841 = shalt.err (!%p3838_p0)
}
 0x124   : > { %3385 = dma.hbm_to_vmem [thread:$0]  (!%p5120_p11), %s4503_s15, 2048, %s4507_s23, %s4344_s2, %s4001_s30, %s4001_s30, %s4002_s16  }
 0x125   : > { %p5122_p2 = scmp.ne.s32.totalorder %s5087_s19, 0 }
 0x126   : > { %s693_s7 = sand.u32 (!%p5122_p2), 1, %s4156_s17   ;;  %s4538_s20 = sand.u32 (!%p5122_p2), 1, %s3968_s25  }
 0x127   : > { %691 = sbr.rel (%p5122_p2) target bundleno = 3312 (0xcf0), region = 84  ;;  %s5055_s14 = sshll.u32 (!%p5122_p2), %s4538_s20, 3 }
 0x128   : > { %s694_s24 = scalar_lea.sflag (!%p5122_p2), [#allocation4], %s693_s7  ;;  %s4543_s4 = scalar_lea.vmem (!%p5122_p2), [#allocation3], %s5055_s14 }
 0x129   : > { %p5123_p3 = scmp.ne.s32.totalorder (!%p5122_p2), %s5093_s13, 0 }
 0x12e   : > { %3915 = dma.done.wait (%p5123_p3), %s694_s24, 128  }
 0x12f   : > { %3917 = vsyncadd (%p5123_p3), %s694_s24, 4294967168  ;;  %s703_s19 = scalar_lea.sflag [#allocation7], %s693_s7 }
 0x130   : > { %3919 = dma.done.wait (%p5123_p3), %s703_s19, 16  }
 0x131   : > { %3921 = vsyncadd (%p5123_p3), %s703_s19, 4294967280  ;;  %p5124_p11 = scmp.eq.s32.totalorder %s4156_s17, 0 }
 0x133   : > { %3923 = dma.done.wait (%p5124_p11), [#allocation7], 16   ;;  %p5125_p7 = pmov %p5124_p11 }
 0x135   : > { %3925 = vsyncadd (%p5125_p7), [#allocation7], 4294967280  ;;  %p5126_p8 = pmov %p5125_p7 }
 0x136   : > { %p5127_p1 = pmov %p5125_p7 }
 0x137   : > { %3927 = dma.done.wait (%p5126_p8), [#allocation10], 16  }
 0x138   : > { %3929 = vsyncadd (%p5127_p1), [#allocation10], 4294967280  ;;  %s5128_s30 = sld [smem:[#allocation34_spill]]  ;;  %s720_s16 = sand.u32 1, %s3956_s22  }
 0x139   : > { %s3336_s15 = smul.u32 192, %s720_s16 }
 0x13b   : > { %s4563_s6 = scalar_lea.vmem [#allocation11], %s3336_s15 }
 0x13e   : > { %p5129_p10 = scmp.ne.s32.totalorder %s5128_s30, 0 }
 0x140   : > { %3931 = dma.done.wait (%p5129_p10), %s694_s24, 3072  }
 0x141   : > { %3933 = vsyncadd (%p5129_p10), %s694_s24, 4294964224  ;;  %s3094_s13 = sshll.u32 %s720_s16, 6 }
 0x142   : > { %s4569_s23 = scalar_lea.vmem [#allocation12], %s3094_s13 }
 0x143   : > { %3935 = dma.done.wait (%p5129_p10), %s703_s19, 1024  }
 0x144   : > { %3937 = vsyncadd (%p5129_p10), %s703_s19, 4294966272  ;;  %s3095_s17 = sshll.u32 %s720_s16, 7 }
 0x145   : > { %s4575_s26 = scalar_lea.vmem [#allocation13], %s3095_s17 }
 0x146   : > { %3939 = dma.done.wait (%p5129_p10), %s694_s24, 2048  }
 0x147   : > { %3941 = vsyncadd (%p5129_p10), %s694_s24, 4294965248  ;;  %s4581_s9 = scalar_lea.vmem [#allocation14], %s3095_s17 }
 0x148   : > { %3943 = dma.done.wait (%p5129_p10), %s703_s19, 2048  }
 0x149   : > { %3945 = vsyncadd (%p5129_p10), %s703_s19, 4294965248  ;;  %s5130_s8 = sld [smem:[#allocation30_spill]]  ;;  %s5131_s28 = sld [smem:[#allocation48_spill]] }
 0x14a   : > { %s5134_s14 = sld [smem:[#allocation46_spill]]  ;;  %s5135_s25 = sld [smem:[#allocation52_spill]] }
 0x14b   : > { %s5137_s19 = sld [smem:[#allocation55_spill]]  ;;  %s5138_s13 = sld [smem:[#allocation56_spill]] }
 0x14f   : > { %p848_p13 = scmp.lt.s32.totalorder %s5130_s8, 1  ;;  %p3099_p12 = scmp.ne.s32.totalorder %s5130_s8, 0 }
 0x150   : > { %v879_v0 = vld [vmem:[%s4543_s4] sm:$0xff] (!%p3099_p12)  ;;  %v3100_v9 = vld [vmem:[#allocation8] ss:$0 sm:$0xff] (!%p3099_p12)  ;;  %v3101_v11 = vld [vmem:[#allocation9] ss:$0 sm:$0xff] (!%p3099_p12) }
 0x151   : > { %s4589_s21 = scalar_select %p848_p13, %s5130_s8, 1 }
 0x152   : > { %882 = vadd.xlane.f32.xlu0 (!%p3099_p12), %v879_v0 }
 0x153   : > { %s3337_s5 = smul.u32 3, %s4589_s21  ;;  %s854_s1 = scalar_lea.vmem %s5131_s28, %s4589_s21 }
 0x154   : > { %s3098_s10 = sshll.u32 %s4589_s21, 1  ;;  %s5136_s28 = sld [smem:[#allocation54_spill]] }
 0x155   : > { %s4607_s3 = scalar_lea.vmem %s5134_s14, %s3337_s5  ;;  %s4613_s22 = scalar_lea.vmem %s5135_s25, %s3098_s10 }
 0x156   : > { %s870_s30 = scalar_lea.vmem %s5137_s19, %s4589_s21  ;;  %s873_s2 = scalar_lea.vmem %s5138_s13, %s4589_s21 }
 0x157   : > { %s5139_s14 = sshll.u32 %s4538_s20, 3  ;;  %878 = sbr.rel (%p3099_p12) target bundleno = 650 (0x28a), region = 120 }
 0x158   : > { %s4629_s5 = scalar_lea.vmem [#allocation15], %s5139_s14 }
 0x15a   : > { %s867_s18 = scalar_lea.vmem %s5136_s28, %s4589_s21 }
 0x1df   : > { %v883_v1 = vpop.xlane.xlu0 %882 }
 0x1e0   : > { %v885_v2 = vmul.f32 0.0078125, %v883_v1 }
 0x1e2   : > { %v886_v3 = vsub.f32 %v879_v0, %v885_v2 }
 0x1e4   : > { %v887_v4 = vmul.f32 %v886_v3, %v886_v3 }
 0x1e6   : > { %888 = vadd.xlane.f32.xlu0 %v887_v4 }
 0x273   : > { %v889_v5 = vpop.xlane.xlu0 %888 }
 0x274   : > { %v890_v6 = vmul.f32 0.0078125, %v889_v5 }
 0x276   : > { %v891_v7 = vadd.f32 1e-12, %v890_v6 }
 0x278   : > { %3500 = vrsqrt.f32 %v891_v7 }
 0x282   : > { %v3501_v8 = vpop.eup %3500 }
 0x283   : > { %v893_v10 = vmul.f32 %v3501_v8, %v886_v3 }
 0x285   : > { %v900_v12 = vmul.f32 %v3100_v9, %v893_v10 }
 0x287   : > { %v907_v13 = vadd.f32 %v3101_v11, %v900_v12 }
 0x289   : > { %908 = vst [vmem:[#allocation2] sm:$0xff] %v907_v13 }
 0x28a PF: > { %v3502_v14 = vld [vmem:[%s4563_s6 + $0x4] ss:$12 sps:$4 sm:$0xff]   ;;  %v3504_v15 = vld [vmem:[%s4563_s6] ss:$12 sps:$4 sm:$0xff]   ;;  %v4008_v16 = vmov 0   ;;  %v4009_v34 = vmov 0.0   ;;  %v945_v37 = vlaneseq }
 0x28b   : > { %1120 = vmatprep.mubr.bf16.mxu0 %v4008_v16  ;;  %1088 = vmatprep.subr.bf16.mxu0 %v3502_v14  ;;  %v3505_v17 = vld [vmem:[%s4563_s6 + $0x1c] ss:$12 sps:$4 sm:$0xff]   ;;  %v3507_v18 = vld [vmem:[%s4563_s6 + $0x18] ss:$12 sps:$4 sm:$0xff]   ;;  %v3508_v19 = vld [vmem:[%s4563_s6 + $0x34] ss:$12 sps:$4 sm:$0xff]  }
 0x28c   : > { %1089 = vmatpush1.bf16.msra.mxu0 %v3504_v15  ;;  %v3510_v20 = vld [vmem:[%s4563_s6 + $0x30] ss:$12 sps:$4 sm:$0xff]   ;;  %v3511_v21 = vld [vmem:[%s4563_s6 + $0x4c] ss:$12 sps:$4 sm:$0xff]   ;;  %v3513_v22 = vld [vmem:[%s4563_s6 + $0x48] ss:$12 sps:$4 sm:$0xff]   ;;  %3246 = vmatprep.subr.bf16.mxu1 %v4009_v34 }
 0x28d   : > { %1090 = vmatprep.subr.bf16.mxu0 %v3505_v17  ;;  %v3514_v23 = vld [vmem:[%s4563_s6 + $0x64] ss:$12 sps:$4 sm:$0xff]   ;;  %v3516_v24 = vld [vmem:[%s4563_s6 + $0x60] ss:$12 sps:$4 sm:$0xff]   ;;  %v3517_v25 = vld [vmem:[%s4563_s6 + $0x7c] ss:$12 sps:$4 sm:$0xff]  }
 0x28e   : > { %v3519_v26 = vld [vmem:[%s4563_s6 + $0x78] ss:$12 sps:$4 sm:$0xff]   ;;  %v3520_v27 = vld [vmem:[%s4563_s6 + $0x94] ss:$12 sps:$4 sm:$0xff]   ;;  %v3522_v28 = vld [vmem:[%s4563_s6 + $0x90] ss:$12 sps:$4 sm:$0xff]  }
 0x28f   : > { %v3523_v29 = vld [vmem:[%s4563_s6 + $0xac] ss:$12 sps:$4 sm:$0xff]   ;;  %v3525_v30 = vld [vmem:[%s4563_s6 + $0xa8] ss:$12 sps:$4 sm:$0xff]   ;;  %v4662_v38 = vshrl.u32 %v945_v37, 7  ;;  %s4011_s10 = smov 96  }
 0x290   : > { %1091 = vmatpush1.bf16.msra.mxu0 %v3507_v18  ;;  %v4650_v31 = vld [vmem:[#allocation2] sm:$0xff]  ;;  %v3529_v39 = vld [vmem:[%s4563_s6 + $0x50] ss:$12 sps:$4 sm:$0xff]   ;;  %s4012_s12 = smov 64   ;;  %vm4013_vm0 = vmmov 0   ;;  %vm1676_vm1 = vcmask 261120  }
 0x291   : > { %1092 = vmatprep.subr.bf16.mxu0 %v3508_v19  ;;  %v910_v32 = vpack.c.bf16 %v4650_v31, %v4650_v31  ;;  %v3526_v33 = vld [vmem:[%s4563_s6 + $0x8] ss:$12 sps:$4 sm:$0xff]   ;;  %v3527_v35 = vld [vmem:[%s4563_s6 + $0x20] ss:$12 sps:$4 sm:$0xff]   ;;  %v3528_v36 = vld [vmem:[%s4563_s6 + $0x38] ss:$12 sps:$4 sm:$0xff]   ;;  %3262 = vmatprep.mubr.msk.bf16.mxu1 %vm4013_vm0, %v4009_v34 }
 0x292   : > { %3247 = vmatpush3.bf16.msra.mxu1 %v3526_v33  ;;  %v951_v40 = vsub.s32 1, %v4662_v38  ;;  %v4667_v41 = vld [vmem:[%s4607_s3] sm:$0x7]  ;;  %v947_v42 = vsub.s32 0, %v4662_v38  ;;  %v3530_v44 = vld [vmem:[%s4563_s6 + $0x68] ss:$12 sps:$4 sm:$0xff]  }
 0x293   : > { %3248 = vmatprep.subr.bf16.mxu1 %v4009_v34  ;;  %s4010_s3 = smov 32   ;;  %v3531_v53 = vld [vmem:[%s4563_s6 + $0x80] ss:$12 sps:$4 sm:$0xff]   ;;  %v3532_v55 = vld [vmem:[%s4563_s6 + $0x98] ss:$12 sps:$4 sm:$0xff]   ;;  %s5140_s25 = scalar_lea.vmem [#allocation6], %s4538_s20 }
 0x294   : > { %1093 = vmatpush1.bf16.msra.mxu0 %v3510_v20  ;;  %v952_v43 = vrot.slane %v4667_v41, %v951_v40  ;;  %v948_v45 = vrot.slane %v4667_v41, %v947_v42  ;;  %v3533_v56 = vld [vmem:[%s4563_s6 + $0xb0] ss:$12 sps:$4 sm:$0xff]   ;;  %v4014_v57 = vmov 1983009808   ;;  %v4015_v59 = vmov 1934713408  }
 0x295   : > { %1094 = vmatprep.subr.bf16.mxu0 %v3511_v21  ;;  %v1178_v58 = vunpack.c.l.s4 %v4014_v57  ;;  %v1195_v60 = vunpack.c.l.s4 %v4015_v59  ;;  %vm1876_vm2 = vcmask 64512   ;;  %vm1928_vm3 = vcmask 1043456   ;;  %s5144_s17 = sld [smem:[#allocation50_spill]]  ;;  %s5147_s28 = sld [smem:[#allocation31_spill]] }
 0x296   : > { %3249 = vmatpush3.bf16.msra.mxu1 %v3527_v35  ;;  %vm2259_vm4 = vcmask 523264   ;;  %vm2261_vm5 = vcmask 785408   ;;  %s5151_s4 = sld [smem:[#allocation57_spill]] }
 0x297   : > { %3250 = vmatprep.subr.bf16.mxu1 %v4009_v34  ;;  %v1179_v61 = vunpack.c.0.s8 %v1178_v58  ;;  %v1196_v62 = vunpack.c.0.s8 %v1195_v60 }
 0x298   : > { %1095 = vmatpush1.bf16.msra.mxu0 %v3513_v22 }
 0x299   : > { %1096 = vmatprep.subr.bf16.mxu0 %v3514_v23  ;;  %v4698_v63 = vsub.s32 %v1179_v61, %v4662_v38  ;;  %v4701_v2 = vsub.s32 %v1196_v62, %v4662_v38 }
 0x29a   : > { %3251 = vmatpush3.bf16.msra.mxu1 %v3528_v36 }
 0x29b   : > { %3252 = vmatprep.subr.bf16.mxu1 %v4009_v34  ;;  %s5145_s11 = scalar_lea.vmem %s5144_s17, %s4589_s21 }
 0x29c   : > { %1097 = vmatpush1.bf16.msra.mxu0 %v3516_v24 }
 0x29d   : > { %1098 = vmatprep.subr.bf16.mxu0 %v3517_v25 }
 0x29e   : > { %3253 = vmatpush3.bf16.msra.mxu1 %v3529_v39 }
 0x29f   : > { %3254 = vmatprep.subr.bf16.mxu1 %v4009_v34 }
 0x2a0   : > { %1099 = vmatpush1.bf16.msra.mxu0 %v3519_v26 }
 0x2a1   : > { %1100 = vmatprep.subr.bf16.mxu0 %v3520_v27 }
 0x2a2   : > { %3255 = vmatpush3.bf16.msra.mxu1 %v3530_v44 }
 0x2a3   : > { %3256 = vmatprep.subr.bf16.mxu1 %v4009_v34 }
 0x2a4   : > { %1101 = vmatpush1.bf16.msra.mxu0 %v3522_v28 }
 0x2a5   : > { %1102 = vmatprep.subr.bf16.mxu0 %v3523_v29 }
 0x2a6   : > { %3257 = vmatpush3.bf16.msra.mxu1 %v3531_v53 }
 0x2a7   : > { %3258 = vmatprep.subr.bf16.mxu1 %v4009_v34 }
 0x2a8   : > { %1103 = vmatpush1.bf16.msra.mxu0 %v3525_v30 }
 0x2a9   : > { %3290 = vmatprep.subr.bf16.mxu0 %v4009_v34 }
 0x2aa   : > { %3259 = vmatpush3.bf16.msra.mxu1 %v3532_v55 }
 0x2ab   : > { %1121 = vmatmul.mubr.bf16.vlgmr.msra.gmra.mrb[0].mxu0 %v910_v32  ;;  %3260 = vmatprep.subr.bf16.mxu1 %v4009_v34 }
 0x2ac   : > { %3292 = vmatprep.mubr.msk.bf16.mxu0 %vm4013_vm0, %v4009_v34 }
 0x2ae   : > { %3261 = vmatpush3.bf16.msra.mxu1 %v3533_v56 }
 0x2af   : > { %3266 = vmatprep.subr.bf16.mxu1 %v4009_v34 }
 0x2b1   : > { %3263 = vmatmul.mubr.bf16.vlgmr.msra.gmra.mrb[0].mxu1 %v910_v32 }
 0x2b2   : > { %3268 = vmatprep.mubr.msk.bf16.mxu1 %vm4013_vm0, %v4009_v34 }
 0x37e   : > { %v1122_v46 = vpop.f32.mrb[0].mxu0 }
 0x37f   : > { %v1124_v47 = vpop.f32.mrb[1].mxu0  ;;  %v1123_v51 = vadd.f32 %v1122_v46, %v948_v45 }
 0x380   : > { %v1125_v48 = vadd.f32 %v1124_v47, %v952_v43  ;;  %v1126_v49 = vpop.f32.mrb[2].mxu0 }
 0x381   : > { %v1127_v50 = vpop.f32.mrb[3].mxu0  ;;  %v1169_v54 = vpack.c.bf16 %v1123_v51, %v1123_v51 }
 0x382   : > { %v1338_v52 = vpack.c.bf16 %v1125_v48, %v1125_v48 }
 0x383   : > { %v1183_v20 = vrot.slane %v1169_v54, %v4698_v63 }
 0x384   : > { %1344 = vrot.lane.b32.xlu1 %v1338_v52, %s4010_s3  ;;  %1340 = vrot.lane.b32.xlu0 %v1338_v52, %s4011_s10  ;;  %v1352_v12 = vrot.slane %v1338_v52, %v4698_v63 }
 0x388   : > { %1342 = vrot.lane.b32.xlu0 %v1338_v52, %s4012_s12  ;;  %1171 = vrot.lane.b32.xlu1 %v1169_v54, %s4011_s10 }
 0x38c   : > { %1173 = vrot.lane.b32.xlu0 %v1169_v54, %s4012_s12  ;;  %1175 = vrot.lane.b32.xlu1 %v1169_v54, %s4010_s3 }
 0x3f6   : > { %v1345_v0 = vpop.permute.xlu1 %1344  ;;  %v1341_v1 = vpop.permute.xlu0 %1340 }
 0x3f7   : > { %v1394_v3 = vrot.slane %v1345_v0, %v4698_v63  ;;  %v1386_v4 = vrot.slane %v1341_v1, %v4698_v63 }
 0x3f9   : > { %v1395_v5 = vcombine.low %v1386_v4, %v1394_v3  ;;  %v1396_v6 = vcombine.high %v1386_v4, %v1394_v3 }
 0x3fa   : > { %v1343_v7 = vpop.permute.xlu0 %1342  ;;  %v1172_v8 = vpop.permute.xlu1 %1171 }
 0x3fb   : > { %v1403_v9 = vrot.slane %v1395_v5, %v4701_v2  ;;  %v1410_v10 = vrot.slane %v1396_v6, %v4701_v2  ;;  %v1360_v11 = vrot.slane %v1343_v7, %v4698_v63  ;;  %v1217_v18 = vrot.slane %v1172_v8, %v4698_v63 }
 0x3fd   : > { %v1411_v13 = vcombine.high %v1403_v9, %v4008_v16  ;;  %v1412_v14 = vcombine.high %v1410_v10, %v4008_v16  ;;  %v1361_v15 = vcombine.low %v1352_v12, %v1360_v11  ;;  %v1362_v17 = vcombine.high %v1352_v12, %v1360_v11 }
 0x3fe   : > { %v1174_v19 = vpop.permute.xlu0 %1173  ;;  %v1176_v21 = vpop.permute.xlu1 %1175  ;;  %v1418_v22 = vshrl.u32 %v1403_v9, 16  ;;  %v1434_v23 = vshrl.u32 %v1410_v10, 16 }
 0x3ff   : > { %v1191_v24 = vrot.slane %v1174_v19, %v4698_v63  ;;  %v1225_v25 = vrot.slane %v1176_v21, %v4698_v63  ;;  %v1426_v26 = vshrl.u32 %v1411_v13, 16  ;;  %v1442_v27 = vshrl.u32 %v1412_v14, 16 }
 0x400   : > { %v1369_v28 = vrot.slane %v1361_v15, %v4701_v2  ;;  %v1376_v29 = vrot.slane %v1362_v17, %v4701_v2 }
 0x401   : > { %v1192_v30 = vcombine.low %v1183_v20, %v1191_v24  ;;  %v1193_v32 = vcombine.high %v1183_v20, %v1191_v24  ;;  %v1226_v33 = vcombine.low %v1217_v18, %v1225_v25  ;;  %v1227_v35 = vcombine.high %v1217_v18, %v1225_v25 }
 0x402   : > { %v1377_v36 = vcombine.high %v1369_v28, %v4008_v16  ;;  %v1378_v37 = vcombine.high %v1376_v29, %v4008_v16  ;;  %v1415_v39 = vpack.i.b16 %v1403_v9, %v1369_v28  ;;  %v1417_v43 = vshrl.u32 %v1369_v28, 16 }
 0x403   : > { %v1431_v44 = vpack.i.b16 %v1410_v10, %v1376_v29  ;;  %v1433_v45 = vshrl.u32 %v1376_v29, 16  ;;  %v1200_v46 = vrot.slane %v1192_v30, %v4701_v2  ;;  %v1207_v47 = vrot.slane %v1193_v32, %v4701_v2 }
 0x404   : > { %v1419_v48 = vpack.i.b16 %v1418_v22, %v1417_v43  ;;  %v1423_v49 = vpack.i.b16 %v1411_v13, %v1377_v36  ;;  %v1425_v50 = vshrl.u32 %v1377_v36, 16  ;;  %v1439_v51 = vpack.i.b16 %v1412_v14, %v1378_v37 }
 0x405   : > { %v1435_v52 = vpack.i.b16 %v1434_v23, %v1433_v45  ;;  %v1441_v53 = vshrl.u32 %v1378_v37, 16  ;;  %v1445_v54 = vcombine.low %v1415_v39, %v1431_v44  ;;  %v1208_v55 = vcombine.high %v1200_v46, %v4008_v16 }
 0x406   : > { %v1427_v56 = vpack.i.b16 %v1426_v26, %v1425_v50  ;;  %v1453_v57 = vcombine.low %v1423_v49, %v1439_v51  ;;  %v1209_v58 = vcombine.high %v1207_v47, %v4008_v16  ;;  %v1248_v62 = vshrl.u32 %v1200_v46, 16 }
 0x407   : > { %v1443_v59 = vpack.i.b16 %v1442_v27, %v1441_v53  ;;  %v1452_v60 = vrot.slane %v1445_v54, %v4698_v63  ;;  %v1470_v61 = vcombine.low %v1419_v48, %v1435_v52  ;;  %v1256_v0 = vshrl.u32 %v1208_v55, 16 }
 0x408   : > { %v1264_v1 = vshrl.u32 %v1207_v47, 16  ;;  %v1234_v3 = vrot.slane %v1226_v33, %v4701_v2  ;;  %v1241_v4 = vrot.slane %v1227_v35, %v4701_v2  ;;  %v1272_v6 = vshrl.u32 %v1209_v58, 16 }
 0x409   : > { %v1478_v5 = vcombine.low %v1427_v56, %v1443_v59  ;;  %v1460_v7 = vrot.slane %v1453_v57, %v4698_v63  ;;  %v1477_v8 = vrot.slane %v1470_v61, %v4698_v63 }
 0x40a   : > { %v1242_v9 = vcombine.high %v1234_v3, %v4008_v16  ;;  %v1243_v10 = vcombine.high %v1241_v4, %v4008_v16  ;;  %v1246_v11 = vpack.i.b16 %v1234_v3, %v1200_v46  ;;  %v1249_v12 = vshrl.u32 %v1234_v3, 16 }
 0x40b   : > { %v1262_v13 = vpack.i.b16 %v1241_v4, %v1207_v47  ;;  %v1265_v14 = vshrl.u32 %v1241_v4, 16  ;;  %v1461_v15 = vcombine.low %v1452_v60, %v1460_v7  ;;  %v1485_v17 = vrot.slane %v1478_v5, %v4698_v63 }
 0x40c   : > { %v1250_v18 = vpack.i.b16 %v1249_v12, %v1248_v62  ;;  %v1254_v19 = vpack.i.b16 %v1242_v9, %v1208_v55  ;;  %v1257_v20 = vshrl.u32 %v1242_v9, 16  ;;  %v1270_v21 = vpack.i.b16 %v1243_v10, %v1209_v58  ;;  %v1163_v9 = vpop.f32.mrb[0].mxu1 }
 0x40d   : > { %v1266_v22 = vpack.i.b16 %v1265_v14, %v1264_v1  ;;  %v1273_v23 = vshrl.u32 %v1243_v10, 16  ;;  %v1276_v25 = vcombine.low %v1246_v11, %v1262_v13  ;;  %v1486_v27 = vcombine.low %v1477_v8, %v1485_v17  ;;  %v3264_v10 = vpop.f32.mrb[1].mxu1  ;;  %v3130_v14 = vld [vmem:[%s5140_s25] ss:$0 sm:$0xff] }
 0x40e   : > { %v1258_v24 = vpack.i.b16 %v1257_v20, %v1256_v0  ;;  %v1284_v26 = vcombine.low %v1254_v19, %v1270_v21  ;;  %v1468_v32 = vrot.slane %v1461_v15, %v4701_v2  ;;  %v1166_v11 = vpop.f32.mrb[2].mxu1 }
 0x40f   : > { %v1274_v28 = vpack.i.b16 %v1273_v23, %v1272_v6  ;;  %v1301_v29 = vcombine.low %v1250_v18, %v1266_v22  ;;  %v1493_v33 = vrot.slane %v1486_v27, %v4701_v2  ;;  %v1283_v36 = vrot.slane %v1276_v25, %v4698_v63  ;;  %v3265_v12 = vpop.f32.mrb[3].mxu1 }
 0x410   : > { %v1291_v30 = vrot.slane %v1284_v26, %v4698_v63  ;;  %v1498_v48 = vshrl.u32 %v1468_v32, 16  ;;  %v1469_v56 = vcombine.high %v1468_v32, %v4008_v16 }
 0x411   : > { %v1309_v35 = vcombine.low %v1258_v24, %v1274_v28  ;;  %v1497_v37 = vpack.i.b16 %v1493_v33, %v1468_v32  ;;  %v1308_v39 = vrot.slane %v1301_v29, %v4698_v63  ;;  %v1499_v46 = vshrl.u32 %v1493_v33, 16 }
 0x412   : > { %v1292_v44 = vcombine.low %v1283_v36, %v1291_v30  ;;  %v1494_v54 = vcombine.high %v1493_v33, %v4008_v16  ;;  %v1504_v0 = vshrl.u32 %v1469_v56, 16  ;;  %v955_v30 = vsub.s32 2, %v4662_v38 }
 0x413   : > { %v1316_v43 = vrot.slane %v1309_v35, %v4698_v63  ;;  %v1681_v45 = vsel %vm1676_vm1, %v1497_v37, 0  ;;  %v1500_v51 = vpack.i.b16 %v1499_v46, %v1498_v48 }
 0x414   : > { %3267 = vmatpush3.bf16.xpose.msra.mxu1 %v1681_v45  ;;  %v1299_v50 = vrot.slane %v1292_v44, %v4701_v2  ;;  %v1503_v58 = vpack.i.b16 %v1494_v54, %v1469_v56  ;;  %v1505_v61 = vshrl.u32 %v1494_v54, 16 }
 0x415   : > { %v1317_v47 = vcombine.low %v1308_v39, %v1316_v43  ;;  %3272 = vmatprep.subr.bf16.mxu1 %v4009_v34  ;;  %v1727_v53 = vsel %vm1676_vm1, %v1500_v51, 0  ;;  %v956_v39 = vrot.slane %v4667_v41, %v955_v30 }
 0x416   : > { %v1329_v57 = vshrl.u32 %v1299_v50, 16  ;;  %v1773_v60 = vsel %vm1676_vm1, %v1503_v58, 0  ;;  %v1300_v1 = vcombine.high %v1299_v50, %v4008_v16  ;;  %v1506_v3 = vpack.i.b16 %v1505_v61, %v1504_v0 }
 0x417   : > { %v1324_v49 = vrot.slane %v1317_v47, %v4701_v2  ;;  %v1164_v45 = vadd.f32 %v1163_v9, %v956_v39 }
 0x418   : > { %v1819_v5 = vsel %vm1676_vm1, %v1506_v3, 0  ;;  %v1335_v7 = vshrl.u32 %v1300_v1, 16 }
 0x419   : > { %v1328_v52 = vpack.i.b16 %v1324_v49, %v1299_v50  ;;  %v1330_v55 = vshrl.u32 %v1324_v49, 16  ;;  %v1325_v62 = vcombine.high %v1324_v49, %v4008_v16  ;;  %v1507_v51 = vpack.c.bf16 %v1164_v45, %v1164_v45 }
 0x41b   : > { %3269 = vmatmul.mubr.msk.bf16.vlgmr.msra.gmra.mrb[4].mxu1 %vm1676_vm1, %v1328_v52  ;;  %v1331_v59 = vpack.i.b16 %v1330_v55, %v1329_v57  ;;  %v1334_v4 = vpack.i.b16 %v1325_v62, %v1300_v1  ;;  %v1336_v6 = vshrl.u32 %v1325_v62, 16 }
 0x41c   : > { %3273 = vmatpush3.bf16.xpose.msra.mxu1 %v1727_v53  ;;  %3274 = vmatprep.mubr.msk.bf16.mxu1 %vm4013_vm0, %v4009_v34 }
 0x41d   : > { %3278 = vmatprep.subr.bf16.mxu1 %v4009_v34  ;;  %v1337_v8 = vpack.i.b16 %v1336_v6, %v1335_v7 }
 0x423   : > { %3275 = vmatmul.mubr.msk.bf16.vlgmr.msra.gmra.mrb[8].mxu1 %vm1676_vm1, %v1331_v59 }
 0x424   : > { %3279 = vmatpush3.bf16.xpose.msra.mxu1 %v1773_v60  ;;  %3280 = vmatprep.mubr.msk.bf16.mxu1 %vm4013_vm0, %v4009_v34 }
 0x425   : > { %3284 = vmatprep.subr.bf16.mxu1 %v4009_v34 }
 0x42b   : > { %3281 = vmatmul.mubr.msk.bf16.vlgmr.msra.gmra.mrb[12].mxu1 %vm1676_vm1, %v1334_v4 }
 0x42c   : > { %3285 = vmatpush3.bf16.xpose.msra.mxu1 %v1819_v5  ;;  %3286 = vmatprep.mubr.msk.bf16.mxu1 %vm4013_vm0, %v4009_v34 }
 0x42d   : > { %3296 = vmatprep.subr.bf16.mxu1 %v4009_v34 }
 0x433   : > { %3287 = vmatmul.mubr.msk.bf16.vlgmr.msra.gmra.mrb[16].mxu1 %vm1676_vm1, %v1337_v8 }
 0x434   : > { %3298 = vmatprep.mubr.msk.bf16.mxu1 %vm4013_vm0, %v4009_v34 }
 0x4ee   : > { %v1717_v13 = vpop.f32.mrb[4].mxu1 }
 0x4ef   : > { %v1861_v15 = vmul.f32 0.17677669, %v1717_v13  ;;  %v3270_v17 = vpop.f32.mrb[5].mxu1 }
 0x4f0   : > { %v1720_v18 = vpop.f32.mrb[6].mxu1 }
 0x4f1   : > { %v3271_v19 = vpop.f32.mrb[7].mxu1  ;;  %v1872_v20 = vadd.f32 %v3130_v14, %v1861_v15 }
 0x4f3   : > { %v1877_v21 = vsel %vm1876_vm2, %v1872_v20, -inf }
 0x4f4   : > { %1878 = vmax.xlane.f32.xlu0 %v1877_v21  ;;  %v1521_v21 = vrot.slane %v1507_v51, %v4698_v63 }
 0x4f6   : > { %v1763_v22 = vpop.f32.mrb[8].mxu1 }
 0x4f7   : > { %v1862_v23 = vmul.f32 0.17677669, %v1763_v22  ;;  %v3276_v24 = vpop.f32.mrb[9].mxu1 }
 0x4f8   : > { %v1766_v25 = vpop.f32.mrb[10].mxu1 }
 0x4f9   : > { %v3277_v26 = vpop.f32.mrb[11].mxu1  ;;  %v1873_v27 = vadd.f32 %v3130_v14, %v1862_v23 }
 0x4fb   : > { %v1880_v28 = vsel %vm1876_vm2, %v1873_v27, -inf }
 0x4fc   : > { %1881 = vmax.xlane.f32.xlu1 %v1880_v28 }
 0x4fe   : > { %v1809_v29 = vpop.f32.mrb[12].mxu1 }
 0x4ff   : > { %v1863_v32 = vmul.f32 0.17677669, %v1809_v29  ;;  %v3282_v33 = vpop.f32.mrb[13].mxu1 }
 0x500   : > { %v1812_v35 = vpop.f32.mrb[14].mxu1 }
 0x501   : > { %v3283_v36 = vpop.f32.mrb[15].mxu1  ;;  %v1874_v37 = vadd.f32 %v3130_v14, %v1863_v32 }
 0x503   : > { %v1883_v43 = vsel %vm1876_vm2, %v1874_v37, -inf }
 0x504   : > { %1884 = vmax.xlane.f32.xlu0 %v1883_v43 }
 0x506   : > { %v1855_v44 = vpop.f32.mrb[16].mxu1 }
 0x507   : > { %v1864_v46 = vmul.f32 0.17677669, %v1855_v44  ;;  %v3288_v47 = vpop.f32.mrb[17].mxu1 }
 0x508   : > { %v1858_v48 = vpop.f32.mrb[18].mxu1 }
 0x509   : > { %v3289_v49 = vpop.f32.mrb[19].mxu1  ;;  %v1875_v50 = vadd.f32 %v3130_v14, %v1864_v46 }
 0x50b   : > { %v1886_v52 = vsel %vm1876_vm2, %v1875_v50, -inf }
 0x50c   : > { %1887 = vmax.xlane.f32.xlu0 %v1886_v52 }
 0x50d   : > { %1509 = vrot.lane.b32.xlu1 %v1507_v51, %s4011_s10 }
 0x581   : > { %v1879_v53 = vpop.xlane.xlu0 %1878 }
 0x582   : > { %v1889_v54 = vsub.f32 %v1872_v20, %v1879_v53 }
 0x584   : > { %v1893_v55 = vmul.f32 1.442695, %v1889_v54 }
 0x586   : > { %3582 = vpow2.f32 %v1893_v55 }
 0x589   : > { %v1882_v41 = vpop.xlane.xlu1 %1881 }
 0x58a   : > { %v1890_v56 = vsub.f32 %v1873_v27, %v1882_v41 }
 0x58c   : > { %v1895_v57 = vmul.f32 1.442695, %v1890_v56 }
 0x58d   : > { %v1510_v10 = vpop.permute.xlu1 %1509 }
 0x58e   : > { %3584 = vpow2.f32 %v1895_v57  ;;  %v1555_v14 = vrot.slane %v1510_v10, %v4698_v63 }
 0x590   : > { %v4772_v58 = vpop.eup %3582 }
 0x591   : > { %v1901_v59 = vsel %vm1876_vm2, %v4772_v58, 0.0  ;;  %v1885_v62 = vpop.xlane.xlu0 %1884 }
 0x592   : > { %1902 = vadd.xlane.f32.xlu1 %v1901_v59  ;;  %v1891_v0 = vsub.f32 %v1874_v37, %v1885_v62 }
 0x594   : > { %v1897_v1 = vmul.f32 1.442695, %v1891_v0 }
 0x596   : > { %3586 = vpow2.f32 %v1897_v1 }
 0x598   : > { %v4776_v60 = vpop.eup %3584 }
 0x599   : > { %v1904_v61 = vsel %vm1876_vm2, %v4776_v60, 0.0  ;;  %v1888_v3 = vpop.xlane.xlu0 %1887 }
 0x59a   : > { %1905 = vadd.xlane.f32.xlu0 %v1904_v61  ;;  %v1892_v4 = vsub.f32 %v1875_v50, %v1888_v3 }
 0x59c   : > { %v1899_v5 = vmul.f32 1.442695, %v1892_v4 }
 0x59e   : > { %3588 = vpow2.f32 %v1899_v5 }
 0x5a0   : > { %v4782_v6 = vpop.eup %3586 }
 0x5a1   : > { %v1907_v7 = vsel %vm1876_vm2, %v4782_v6, 0.0 }
 0x5a3   : > { %1513 = vrot.lane.b32.xlu1 %v1507_v51, %s4010_s3 }
 0x5a8   : > { %v4786_v8 = vpop.eup %3588 }
 0x5a9   : > { %v1910_v9 = vsel %vm1876_vm2, %v4786_v8, 0.0 }
 0x5b0   : > { %1511 = vrot.lane.b32.xlu0 %v1507_v51, %s4012_s12 }
 0x5c7   : > { %1908 = vadd.xlane.f32.xlu1 %v1907_v7 }
 0x5cf   : > { %1911 = vadd.xlane.f32.xlu0 %v1910_v9 }
 0x61f   : > { %v1903_v11 = vpop.xlane.xlu1 %1902 }
 0x620   : > { %3590 = vrcp.f32 %v1903_v11 }
 0x623   : > { %v1514_v12 = vpop.permute.xlu1 %1513 }
 0x624   : > { %v1563_v13 = vrot.slane %v1514_v12, %v4698_v63 }
 0x626   : > { %v1564_v15 = vcombine.low %v1555_v14, %v1563_v13  ;;  %v1565_v18 = vcombine.high %v1555_v14, %v1563_v13 }
 0x627   : > { %v1906_v17 = vpop.xlane.xlu0 %1905 }
 0x628   : > { %v1572_v19 = vrot.slane %v1564_v15, %v4701_v2  ;;  %v1579_v23 = vrot.slane %v1565_v18, %v4701_v2  ;;  %3592 = vrcp.f32 %v1906_v17 }
 0x62a   : > { %v1580_v26 = vcombine.high %v1572_v19, %v4008_v16  ;;  %v1581_v29 = vcombine.high %v1579_v23, %v4008_v16  ;;  %v1587_v30 = vshrl.u32 %v1572_v19, 16  ;;  %v1603_v39 = vshrl.u32 %v1579_v23, 16  ;;  %v3591_v61 = vpop.eup %3590 }
 0x62b   : > { %v1512_v20 = vpop.permute.xlu0 %1511  ;;  %v1917_v10 = vmul.f32 %v3591_v61, %v4772_v58 }
 0x62c   : > { %v1529_v22 = vrot.slane %v1512_v20, %v4698_v63  ;;  %v1595_v37 = vshrl.u32 %v1580_v26, 16  ;;  %v1611_v49 = vshrl.u32 %v1581_v29, 16 }
 0x62e   : > { %v1530_v24 = vcombine.low %v1521_v21, %v1529_v22  ;;  %v1531_v25 = vcombine.high %v1521_v21, %v1529_v22 }
 0x630   : > { %v1538_v27 = vrot.slane %v1530_v24, %v4701_v2  ;;  %v1545_v28 = vrot.slane %v1531_v25, %v4701_v2 }
 0x632   : > { %v1546_v32 = vcombine.high %v1538_v27, %v4008_v16  ;;  %v1547_v33 = vcombine.high %v1545_v28, %v4008_v16  ;;  %v1584_v35 = vpack.i.b16 %v1572_v19, %v1538_v27  ;;  %v1586_v36 = vshrl.u32 %v1538_v27, 16  ;;  %v3593_v0 = vpop.eup %3592 }
 0x633   : > { %v1600_v43 = vpack.i.b16 %v1579_v23, %v1545_v28  ;;  %v1602_v44 = vshrl.u32 %v1545_v28, 16  ;;  %v1918_v15 = vmul.f32 %v3593_v0, %v4776_v60  ;;  %v1921_v23 = vpack.c.bf16 %v1917_v10, %v1917_v10 }
 0x634   : > { %v1588_v45 = vpack.i.b16 %v1587_v30, %v1586_v36  ;;  %v1592_v46 = vpack.i.b16 %v1580_v26, %v1546_v32  ;;  %v1594_v47 = vshrl.u32 %v1546_v32, 16  ;;  %v1608_v48 = vpack.i.b16 %v1581_v29, %v1547_v33  ;;  %v3534_v36 = vld [vmem:[%s4569_s23] sm:$0xff]  }
 0x635   : > { %v1604_v50 = vpack.i.b16 %v1603_v39, %v1602_v44  ;;  %v1610_v51 = vshrl.u32 %v1547_v33, 16  ;;  %v1614_v52 = vcombine.low %v1584_v35, %v1600_v43  ;;  %v1922_v25 = vpack.c.bf16 %v1918_v15, %v1918_v15  ;;  %v3537_v39 = vld [vmem:[%s4569_s23 + $0x18] sm:$0xff]   ;;  %v3539_v43 = vld [vmem:[%s4569_s23 + $0x28] sm:$0xff]  }
 0x636   : > { %v1596_v53 = vpack.i.b16 %v1595_v37, %v1594_v47  ;;  %v1622_v54 = vcombine.low %v1592_v46, %v1608_v48  ;;  %v3536_v37 = vld [vmem:[%s4569_s23 + $0x10] sm:$0xff]  }
 0x637   : > { %v1612_v55 = vpack.i.b16 %v1611_v49, %v1610_v51  ;;  %v1639_v41 = vcombine.low %v1588_v45, %v1604_v50  ;;  %v1621_v56 = vrot.slane %v1614_v52, %v4698_v63 }
 0x638   : > { %v1629_v57 = vrot.slane %v1622_v54, %v4698_v63 }
 0x639   : > { %v1647_v59 = vcombine.low %v1596_v53, %v1612_v55  ;;  %v1646_v1 = vrot.slane %v1639_v41, %v4698_v63 }
 0x63a   : > { %v1630_v62 = vcombine.low %v1621_v56, %v1629_v57 }
 0x63b   : > { %v1654_v3 = vrot.slane %v1647_v59, %v4698_v63 }
 0x63c   : > { %v1637_v4 = vrot.slane %v1630_v62, %v4701_v2 }
 0x63d   : > { %v1655_v5 = vcombine.low %v1646_v1, %v1654_v3 }
 0x63e   : > { %v1638_v7 = vcombine.high %v1637_v4, %v4008_v16  ;;  %v1667_v12 = vshrl.u32 %v1637_v4, 16 }
 0x63f   : > { %v1662_v9 = vrot.slane %v1655_v5, %v4701_v2 }
 0x640   : > { %v1673_v17 = vshrl.u32 %v1638_v7, 16 }
 0x641   : > { %v1666_v11 = vpack.i.b16 %v1662_v9, %v1637_v4  ;;  %v1668_v13 = vshrl.u32 %v1662_v9, 16  ;;  %v1663_v14 = vcombine.high %v1662_v9, %v4008_v16 }
 0x643   : > { %v1930_v18 = vsel %vm1928_vm3, %v1666_v11, 0  ;;  %v1669_v19 = vpack.i.b16 %v1668_v13, %v1667_v12  ;;  %v1672_v20 = vpack.i.b16 %v1663_v14, %v1638_v7  ;;  %v1674_v21 = vshrl.u32 %v1663_v14, 16  ;;  %v3540_v12 = vld [vmem:[%s4569_s23 + $0x30] sm:$0xff]  }
 0x644   : > { %3291 = vmatpush3.bf16.msra.mxu0 %v1930_v18 }
 0x645   : > { %v1976_v22 = vsel %vm1928_vm3, %v1669_v19, 0  ;;  %3302 = vmatprep.subr.bf16.mxu0 %v4009_v34  ;;  %v1675_v58 = vpack.i.b16 %v1674_v21, %v1673_v17  ;;  %v2022_v24 = vsel %vm1928_vm3, %v1672_v20, 0 }
 0x646   : > { %3297 = vmatpush3.bf16.msra.mxu1 %v1976_v22 }
 0x647   : > { %3293 = vmatmul.mubr.msk.bf16.vlgmr.msra.gmra.mrb[4].mxu0 %vm1876_vm2, %v1921_v23  ;;  %3308 = vmatprep.subr.bf16.mxu1 %v4009_v34  ;;  %v2068_v60 = vsel %vm1928_vm3, %v1675_v58, 0 }
 0x648   : > { %3303 = vmatpush3.bf16.msra.mxu0 %v2022_v24  ;;  %3304 = vmatprep.mubr.msk.bf16.mxu0 %vm4013_vm0, %v4009_v34 }
 0x649   : > { %3299 = vmatmul.mubr.msk.bf16.vlgmr.msra.gmra.mrb[20].mxu1 %vm1876_vm2, %v1922_v25  ;;  %3314 = vmatprep.subr.bf16.mxu0 %v4009_v34  ;;  %v3541_v25 = vld [vmem:[%s4569_s23 + $0x38] sm:$0xff]  }
 0x64a   : > { %3309 = vmatpush3.bf16.msra.mxu1 %v2068_v60  ;;  %3310 = vmatprep.mubr.msk.bf16.mxu1 %vm4013_vm0, %v4009_v34 }
 0x654   : > { %v1909_v26 = vpop.xlane.xlu1 %1908 }
 0x655   : > { %3594 = vrcp.f32 %v1909_v26 }
 0x65c   : > { %v1912_v27 = vpop.xlane.xlu0 %1911 }
 0x65d   : > { %3596 = vrcp.f32 %v1912_v27 }
 0x65f   : > { %v3595_v28 = vpop.eup %3594 }
 0x660   : > { %v1919_v29 = vmul.f32 %v3595_v28, %v4782_v6  ;;  %v3535_v6 = vld [vmem:[%s4569_s23 + $0x8] sm:$0xff]  }
 0x662   : > { %v1923_v30 = vpack.c.bf16 %v1919_v29, %v1919_v29 }
 0x664   : > { %3305 = vmatmul.mubr.msk.bf16.vlgmr.msra.gmra.mrb[8].mxu0 %vm1876_vm2, %v1923_v30 }
 0x665   : > { %3330 = vmatprep.mubr.msk.bf16.mxu0 %vm4013_vm0, %v4009_v34  ;;  %3315 = vmatpush3.bf16.msra.mxu0 %v3534_v36 }
 0x666   : > { %3316 = vmatprep.subr.bf16.mxu0 %v4009_v34 }
 0x667   : > { %v3597_v32 = vpop.eup %3596 }
 0x668   : > { %v1920_v33 = vmul.f32 %v3597_v32, %v4786_v8  ;;  %v3538_v8 = vld [vmem:[%s4569_s23 + $0x20] sm:$0xff]  }
 0x669   : > { %3317 = vmatpush3.bf16.msra.mxu0 %v3535_v6 }
 0x66a   : > { %v1924_v35 = vpack.c.bf16 %v1920_v33, %v1920_v33  ;;  %3318 = vmatprep.subr.bf16.mxu0 %v4009_v34 }
 0x66c   : > { %3311 = vmatmul.mubr.msk.bf16.vlgmr.msra.gmra.mrb[24].mxu1 %vm1876_vm2, %v1924_v35 }
 0x66d   : > { %2545 = vmatprep.mubr.bf16.mxu1 %v4008_v16  ;;  %3319 = vmatpush3.bf16.msra.mxu0 %v3536_v37 }
 0x66e   : > { %3320 = vmatprep.subr.bf16.mxu0 %v4009_v34 }
 0x671   : > { %3321 = vmatpush3.bf16.msra.mxu0 %v3537_v39 }
 0x672   : > { %3322 = vmatprep.subr.bf16.mxu0 %v4009_v34 }
 0x675   : > { %3323 = vmatpush3.bf16.msra.mxu0 %v3538_v8 }
 0x676   : > { %3324 = vmatprep.subr.bf16.mxu0 %v4009_v34 }
 0x679   : > { %3325 = vmatpush3.bf16.msra.mxu0 %v3539_v43 }
 0x67a   : > { %3326 = vmatprep.subr.bf16.mxu0 %v4009_v34 }
 0x67d   : > { %3327 = vmatpush3.bf16.msra.mxu0 %v3540_v12 }
 0x67e   : > { %3328 = vmatprep.subr.bf16.mxu0 %v4009_v34 }
 0x681   : > { %3329 = vmatpush3.bf16.msra.mxu0 %v3541_v25  ;;  %v3570_v25 = vld [vmem:[%s4581_s9 + $0x50] sm:$0xff]  }
 0x71a   : > { %v1966_v16 = vpop.f32.mrb[4].mxu0 }
 0x71b   : > { %v3294_v44 = vpop.f32.mrb[5].mxu0 }
 0x71c   : > { %v1969_v45 = vpop.f32.mrb[6].mxu0  ;;  %v2012_v46 = vpop.f32.mrb[20].mxu1  ;;  %v3137_v44 = vld [vmem:[%s854_s1] ss:$0 sm:$0xff]  ;;  %s5142_s1 = sld [smem:[#allocation49_spill]] }
 0x71d   : > { %v3295_v47 = vpop.f32.mrb[7].mxu0  ;;  %v3300_v48 = vpop.f32.mrb[21].mxu1 }
 0x71e   : > { %v2015_v49 = vpop.f32.mrb[22].mxu1 }
 0x71f   : > { %v3301_v50 = vpop.f32.mrb[23].mxu1 }
 0x722   : > { %s5143_s19 = scalar_lea.vmem %s5142_s1, %s4589_s21  ;;  %s4016_s21 = smov [#allocation15]  }
 0x737   : > { %v2058_v51 = vpop.f32.mrb[8].mxu0 }
 0x738   : > { %v2110_v52 = vcombine.low %v1966_v16, %v2058_v51  ;;  %v2111_v53 = vcombine.high %v1966_v16, %v2058_v51  ;;  %v3306_v54 = vpop.f32.mrb[9].mxu0  ;;  %v3542_v51 = vld [vmem:[%s4575_s26] ss:$8 sps:$4 sm:$0xff]  }
 0x739   : > { %v2061_v55 = vpop.f32.mrb[10].mxu0  ;;  %v3545_v54 = vld [vmem:[%s4575_s26 + $0x10] ss:$8 sps:$4 sm:$0xff]  }
 0x73a   : > { %v3307_v41 = vpop.f32.mrb[11].mxu0  ;;  %v2118_v0 = vrot.slane %v2110_v52, %v4698_v63  ;;  %v2125_v1 = vrot.slane %v2111_v53, %v4698_v63  ;;  %v3544_v52 = vld [vmem:[%s4575_s26 + $0x4] ss:$8 sps:$4 sm:$0xff]   ;;  %v3547_v53 = vld [vmem:[%s4575_s26 + $0x14] ss:$8 sps:$4 sm:$0xff]  }
 0x73b   : > { %2513 = vmatprep.subr.bf16.mxu1 %v3544_v52  ;;  %v3550_v55 = vld [vmem:[%s4575_s26 + $0x24] ss:$8 sps:$4 sm:$0xff]   ;;  %v3548_v41 = vld [vmem:[%s4575_s26 + $0x20] ss:$8 sps:$4 sm:$0xff]  }
 0x73c   : > { %2514 = vmatpush1.bf16.msra.mxu1 %v3542_v51 }
 0x73d   : > { %2515 = vmatprep.subr.bf16.mxu1 %v3547_v53 }
 0x73f   : > { %v2104_v56 = vpop.f32.mrb[24].mxu1 }
 0x740   : > { %v2126_v57 = vcombine.low %v2012_v46, %v2104_v56  ;;  %v2127_v59 = vcombine.high %v2012_v46, %v2104_v56  ;;  %v3312_v61 = vpop.f32.mrb[25].mxu1  ;;  %2516 = vmatpush1.bf16.msra.mxu1 %v3545_v54 }
 0x741   : > { %v2107_v62 = vpop.f32.mrb[26].mxu1  ;;  %2517 = vmatprep.subr.bf16.mxu1 %v3550_v55  ;;  %v3553_v61 = vld [vmem:[%s4575_s26 + $0x34] ss:$8 sps:$4 sm:$0xff]  }
 0x742   : > { %v2134_v3 = vrot.slane %v2126_v57, %v4698_v63  ;;  %v2141_v4 = vrot.slane %v2127_v59, %v4698_v63  ;;  %v3313_v5 = vpop.f32.mrb[27].mxu1  ;;  %v3551_v62 = vld [vmem:[%s4575_s26 + $0x30] ss:$8 sps:$4 sm:$0xff]  }
 0x743   : > { %v3560_v5 = vld [vmem:[%s4575_s26 + $0x60] ss:$8 sps:$4 sm:$0xff]  }
 0x744   : > { %v2142_v7 = vcombine.low %v2118_v0, %v2134_v3  ;;  %v2143_v9 = vcombine.high %v2118_v0, %v2134_v3  ;;  %v2158_v10 = vcombine.low %v2125_v1, %v2141_v4  ;;  %v2159_v11 = vcombine.high %v2125_v1, %v2141_v4  ;;  %2518 = vmatpush1.bf16.msra.mxu1 %v3548_v41  ;;  %v3556_v0 = vld [vmem:[%s4575_s26 + $0x44] ss:$8 sps:$4 sm:$0xff]   ;;  %v3554_v1 = vld [vmem:[%s4575_s26 + $0x40] ss:$8 sps:$4 sm:$0xff]   ;;  %v3559_v3 = vld [vmem:[%s4575_s26 + $0x54] ss:$8 sps:$4 sm:$0xff]  }
 0x745   : > { %2519 = vmatprep.subr.bf16.mxu1 %v3553_v61  ;;  %v3557_v4 = vld [vmem:[%s4575_s26 + $0x50] ss:$8 sps:$4 sm:$0xff]  }
 0x746   : > { %v2150_v13 = vrot.slane %v2142_v7, %v4701_v2  ;;  %v2157_v14 = vrot.slane %v2143_v9, %v4701_v2  ;;  %v2166_v15 = vrot.slane %v2158_v10, %v4701_v2  ;;  %v2173_v17 = vrot.slane %v2159_v11, %v4701_v2  ;;  %v3562_v7 = vld [vmem:[%s4575_s26 + $0x64] ss:$8 sps:$4 sm:$0xff]   ;;  %v3565_v9 = vld [vmem:[%s4575_s26 + $0x74] ss:$8 sps:$4 sm:$0xff]   ;;  %v3563_v10 = vld [vmem:[%s4575_s26 + $0x70] ss:$8 sps:$4 sm:$0xff]  }
 0x748   : > { %v2178_v18 = vcombine.low %v2150_v13, %v2157_v14  ;;  %v3135_v19 = vcombine.high %v2150_v13, %v2157_v14  ;;  %v2194_v20 = vcombine.low %v2166_v15, %v2173_v17  ;;  %v3136_v21 = vcombine.high %v2166_v15, %v2173_v17  ;;  %2520 = vmatpush1.bf16.msra.mxu1 %v3551_v62  ;;  %v3146_v15 = vld [vmem:[%s5143_s19] ss:$0 sm:$0xff] }
 0x749   : > { %2521 = vmatprep.subr.bf16.mxu1 %v3556_v0  ;;  %v3164_v0 = vld [vmem:[%s867_s18] ss:$0 sm:$0xff]  ;;  %s5148_s18 = sld [smem:[#allocation37_spill]] }
 0x74a   : > { %v2185_v22 = vrot.slane %v2178_v18, %v4698_v63  ;;  %v2193_v23 = vrot.slane %v3135_v19, %v4698_v63  ;;  %v2201_v58 = vrot.slane %v2194_v20, %v4698_v63  ;;  %v2209_v24 = vrot.slane %v3136_v21, %v4698_v63  ;;  %v3147_v18 = vld [vmem:[%s5145_s11] ss:$0 sm:$0xff] }
 0x74c   : > { %v2211_v60 = vcombine.high %v2185_v22, %v2193_v23  ;;  %v2227_v26 = vcombine.high %v2201_v58, %v2209_v24  ;;  %v2210_v27 = vcombine.low %v2185_v22, %v2193_v23  ;;  %v2226_v28 = vcombine.low %v2201_v58, %v2209_v24  ;;  %2522 = vmatpush1.bf16.msra.mxu1 %v3554_v1  ;;  %v3566_v22 = vld [vmem:[%s4581_s9 + $0x40] sm:$0xff]   ;;  %v3568_v58 = vld [vmem:[%s4581_s9 + $0x48] sm:$0xff]  }
 0x74d   : > { %2523 = vmatprep.subr.bf16.mxu1 %v3559_v3  ;;  %v3567_v23 = vld [vmem:[%s4581_s9] sm:$0xff]   ;;  %3224 = vmatprep.subr.bf16.mxu0 %v3566_v22  ;;  %v3569_v24 = vld [vmem:[%s4581_s9 + $0x8] sm:$0xff]  }
 0x74e   : > { %v2225_v29 = vrot.slane %v2211_v60, %v4701_v2  ;;  %v2241_v30 = vrot.slane %v2227_v26, %v4701_v2  ;;  %v2218_v34 = vrot.slane %v2210_v27, %v4701_v2  ;;  %v2234_v32 = vrot.slane %v2226_v28, %v4701_v2  ;;  %v3571_v60 = vld [vmem:[%s4581_s9 + $0x10] sm:$0xff]   ;;  %v3572_v26 = vld [vmem:[%s4581_s9 + $0x58] sm:$0xff]   ;;  %v3574_v28 = vld [vmem:[%s4581_s9 + $0x60] sm:$0xff]  }
 0x74f   : > { %v3573_v27 = vld [vmem:[%s4581_s9 + $0x18] sm:$0xff]   ;;  %p5152_p6 = scmp.ne.s32.totalorder %s5148_s18, 0 }
 0x750   : > { %v2244_v33 = vcombine.low %v2225_v29, %v2241_v30  ;;  %v2243_v35 = vcombine.high %v2218_v34, %v2234_v32  ;;  %v2245_v36 = vcombine.high %v2225_v29, %v2241_v30  ;;  %v2242_v6 = vcombine.low %v2218_v34, %v2234_v32  ;;  %2524 = vmatpush1.bf16.msra.mxu1 %v3557_v4  ;;  %v3575_v29 = vld [vmem:[%s4581_s9 + $0x20] sm:$0xff]   ;;  %v3576_v30 = vld [vmem:[%s4581_s9 + $0x68] sm:$0xff]   ;;  %v3578_v32 = vld [vmem:[%s4581_s9 + $0x70] sm:$0xff]  }
 0x751   : > { %2525 = vmatprep.subr.bf16.mxu1 %v3562_v7  ;;  %v3577_v34 = vld [vmem:[%s4581_s9 + $0x28] sm:$0xff]  }
 0x752   : > { %2251 = vrot.lane.b32.xlu1 %v2244_v33, %s4012_s12  ;;  %2247 = vrot.lane.b32.xlu0 %v2243_v35, %s4010_s3  ;;  %v3579_v33 = vld [vmem:[%s4581_s9 + $0x30] sm:$0xff]   ;;  %v3580_v35 = vld [vmem:[%s4581_s9 + $0x78] sm:$0xff]   ;;  %s2793_s12 = sshll.u32 %s4629_s5, 4  ;;  %s4947_s12 = int_to_ptr.vmem [resolvable:$true] %s2793_s12 }
 0x753   : > { %s3842_s23 = scalar_lea.vmem %s4947_s12, 128 }
 0x754   : > { %2526 = vmatpush1.bf16.msra.mxu1 %v3560_v5  ;;  %p3843_p5 = scmp.ne.s32.totalorder %s4947_s12, %s3842_s23 }
 0x755   : > { %2527 = vmatprep.subr.bf16.mxu1 %v3565_v9 }
 0x756   : > { %2255 = vrot.lane.b32.xlu1 %v2245_v36, %s4011_s10  ;;  %v3581_v36 = vld [vmem:[%s4581_s9 + $0x38] sm:$0xff]   ;;  %s3184_s10 = sshll.u32 %s5147_s28, 7  ;;  %p3844_p9 = pnand %p3843_p5, %p5152_p6 }
 0x757   : > { %s4945_s6 = scalar_lea.hbm %s5151_s4, %s3184_s10 }
 0x758   : > { %2528 = vmatpush1.bf16.msra.mxu1 %v3563_v10  ;;  %p3845_p4 = pneg %p3844_p9 }
 0x7c4   : > { %v2252_v63 = vpop.permute.xlu1 %2251  ;;  %v2248_v37 = vpop.permute.xlu0 %2247 }
 0x7c5   : > { %v2258_v39 = vsel %vm1676_vm1, %v2242_v6, %v2248_v37  ;;  %v2421_v6 = vld [vmem:[%s4613_s22] sm:$0x3] }
 0x7c6   : > { %v2260_v8 = vsel %vm2259_vm4, %v2258_v39, %v2252_v63  ;;  %v2426_v63 = vrot.slane %v2421_v6, %v947_v42  ;;  %v2430_v37 = vrot.slane %v2421_v6, %v951_v40 }
 0x7c8   : > { %v2256_v2 = vpop.permute.xlu1 %2255 }
 0x7c9   : > { %v2262_v43 = vsel %vm2261_vm5, %v2260_v8, %v2256_v2 }
 0x7ca   : > { %v2263_v16 = vpack.c.bf16 %v2262_v43, %v2262_v43 }
 0x7cc   : > { %3331 = vmatmul.mubr.bf16.vlgmr.msra.gmra.mrb[12].mxu0 %v2263_v16 }
 0x7cd   : > { %3225 = vmatpush3.bf16.msra.mxu0 %v3567_v23 }
 0x7ce   : > { %3226 = vmatprep.subr.bf16.mxu0 %v3568_v58 }
 0x7d1   : > { %3227 = vmatpush3.bf16.msra.mxu0 %v3569_v24 }
 0x7d2   : > { %3228 = vmatprep.subr.bf16.mxu0 %v3570_v25 }
 0x7d5   : > { %3229 = vmatpush3.bf16.msra.mxu0 %v3571_v60 }
 0x7d6   : > { %3230 = vmatprep.subr.bf16.mxu0 %v3572_v26 }
 0x7d9   : > { %3231 = vmatpush3.bf16.msra.mxu0 %v3573_v27 }
 0x7da   : > { %3232 = vmatprep.subr.bf16.mxu0 %v3574_v28 }
 0x7dd   : > { %3233 = vmatpush3.bf16.msra.mxu0 %v3575_v29 }
 0x7de   : > { %3234 = vmatprep.subr.bf16.mxu0 %v3576_v30 }
 0x7e1   : > { %3235 = vmatpush3.bf16.msra.mxu0 %v3577_v34 }
 0x7e2   : > { %3236 = vmatprep.subr.bf16.mxu0 %v3578_v32 }
 0x7e5   : > { %3237 = vmatpush3.bf16.msra.mxu0 %v3579_v33 }
 0x7e6   : > { %3238 = vmatprep.subr.bf16.mxu0 %v3580_v35 }
 0x7e9   : > { %3239 = vmatpush3.bf16.msra.mxu0 %v3581_v36 }
 0x89f   : > { %v2369_v45 = vpop.f32.mrb[12].mxu0 }
 0x8a0   : > { %v2370_v46 = vadd.f32 %v3137_v44, %v2369_v45  ;;  %v3332_v47 = vpop.f32.mrb[13].mxu0 }
 0x8a1   : > { %v2372_v48 = vpop.f32.mrb[14].mxu0 }
 0x8a2   : > { %v3333_v49 = vpop.f32.mrb[15].mxu0  ;;  %v2375_v50 = vadd.f32 %v2370_v46, %v4650_v31 }
 0x8a4   : > { %2378 = vadd.xlane.f32.xlu0 %v2375_v50 }
 0x931   : > { %v2379_v31 = vpop.xlane.xlu0 %2378 }
 0x932   : > { %v2381_v56 = vmul.f32 0.0078125, %v2379_v31 }
 0x934   : > { %v2382_v57 = vsub.f32 %v2375_v50, %v2381_v56 }
 0x936   : > { %v2383_v59 = vmul.f32 %v2382_v57, %v2382_v57 }
 0x938   : > { %2384 = vadd.xlane.f32.xlu1 %v2383_v59 }
 0x9c5   : > { %v2385_v11 = vpop.xlane.xlu1 %2384 }
 0x9c6   : > { %v2386_v12 = vmul.f32 0.0078125, %v2385_v11 }
 0x9c8   : > { %v2387_v13 = vadd.f32 1e-12, %v2386_v12 }
 0x9ca   : > { %3598 = vrsqrt.f32 %v2387_v13 }
 0x9d4   : > { %v3599_v14 = vpop.eup %3598 }
 0x9d5   : > { %v2389_v17 = vmul.f32 %v3599_v14, %v2382_v57 }
 0x9d7   : > { %v2396_v19 = vmul.f32 %v3146_v15, %v2389_v17 }
 0x9d9   : > { %v4899_v20 = vadd.f32 %v3147_v18, %v2396_v19  ;;  %v3181_v19 = vld [vmem:[%s870_s30] ss:$0 sm:$0xff]  ;;  %s2780_s30 = scalar_lea.sflag [#allocation5], %s4538_s20 }
 0x9db   : > { %v2404_v21 = vpack.c.bf16 %v4899_v20, %v4899_v20 }
 0x9dd   : > { %2546 = vmatmul.mubr.bf16.vlgmr.msra.gmra.mrb[28].mxu1 %v2404_v21  ;;  %v3182_v21 = vld [vmem:[%s873_s2] ss:$0 sm:$0xff]  ;;  %s3846_s2 = sshll.u32 %s4016_s21, 4  ;;  %s3847_s2 = int_to_ptr.vmem [resolvable:$false] %s3846_s2 }
 0x9de   : > { %s3848_s8 = scalar_lea.vmem %s3847_s2, 256  ;;  %p3849_p0 = scmp.lt.s32.totalorder %s4947_s12, %s3847_s2 }
 0x9df   : > { %p3850_p2 = scmp.lt.s32.totalorder %s3848_s8, %s3842_s23 }
 0x9e1   : > { %p3851_p3 = por %p3850_p2, %p3849_p0 }
 0x9e3   : > { %p3852_p11 = pnand %p3851_p3, %p3845_p4 }
 0xab0   : > { %v2547_v39 = vpop.f32.mrb[28].mxu1 }
 0xab1   : > { %v2548_v2 = vadd.f32 %v2547_v39, %v2426_v63  ;;  %v2549_v8 = vpop.f32.mrb[29].mxu1 }
 0xab2   : > { %v2550_v43 = vadd.f32 %v2549_v8, %v2430_v37  ;;  %v2551_v16 = vpop.f32.mrb[30].mxu1 }
 0xab3   : > { %v2556_v44 = vmul.f32 0.044715, %v2548_v2  ;;  %v2552_v45 = vpop.f32.mrb[31].mxu1  ;;  %v2554_v42 = vmul.f32 0.5, %v2548_v2 }
 0xab4   : > { %v2557_v46 = vmul.f32 0.044715, %v2550_v43  ;;  %v2555_v41 = vmul.f32 0.5, %v2550_v43 }
 0xab5   : > { %v2558_v47 = vmul.f32 %v2556_v44, %v2548_v2 }
 0xab6   : > { %v2559_v48 = vmul.f32 %v2557_v46, %v2550_v43 }
 0xab7   : > { %v2560_v49 = vmul.f32 %v2558_v47, %v2548_v2 }
 0xab8   : > { %v2561_v50 = vmul.f32 %v2559_v48, %v2550_v43 }
 0xab9   : > { %v2562_v51 = vadd.f32 %v2560_v49, %v2548_v2 }
 0xaba   : > { %v2563_v52 = vadd.f32 %v2561_v50, %v2550_v43 }
 0xabb   : > { %v2564_v53 = vmul.f32 0.7978846, %v2562_v51 }
 0xabc   : > { %v2565_v54 = vmul.f32 0.7978846, %v2563_v52 }
 0xabd   : > { %3600 = vtanh.f32 %v2564_v53 }
 0xabe   : > { %3602 = vtanh.f32 %v2565_v54 }
 0xac7   : > { %v3601_v38 = vpop.eup %3600 }
 0xac8   : > { %v3603_v40 = vpop.eup %3602  ;;  %v2568_v55 = vadd.f32 1.0, %v3601_v38 }
 0xac9   : > { %v2569_v31 = vadd.f32 1.0, %v3603_v40 }
 0xaca   : > { %v2570_v56 = vmul.f32 %v2568_v55, %v2554_v42 }
 0xacb   : > { %v2571_v57 = vmul.f32 %v2569_v31, %v2555_v41 }
 0xacc   : > { %v2572_v61 = vpack.c.bf16 %v2570_v56, %v2570_v56 }
 0xacd   : > { %v2573_v59 = vpack.c.bf16 %v2571_v57, %v2571_v57 }
 0xacf   : > { %2741 = vmatprep.mubr.bf16.mxu0 %v2573_v59 }
 0xad0   : > { %2742 = vmatmul.mubr.bf16.vlgmr.msra.gmra.mrb[16].mxu0 %v2572_v61 }
 0xba3   : > { %v3240_v62 = vpop.f32.mrb[16].mxu0 }
 0xba4   : > { %v3241_v1 = vpop.f32.mrb[17].mxu0 }
 0xba5   : > { %v3242_v3 = vadd.f32 %v3241_v1, %v3240_v62  ;;  %v3243_v4 = vpop.f32.mrb[18].mxu0 }
 0xba6   : > { %v3244_v5 = vpop.f32.mrb[19].mxu0 }
 0xba7   : > { %v2744_v7 = vadd.f32 %v3242_v3, %v3164_v0 }
 0xba9   : > { %v2749_v9 = vadd.f32 %v2744_v7, %v4899_v20 }
 0xbab   : > { %2752 = vadd.xlane.f32.xlu0 %v2749_v9 }
 0xc38   : > { %v2753_v10 = vpop.xlane.xlu0 %2752 }
 0xc39   : > { %v2754_v11 = vmul.f32 0.0078125, %v2753_v10 }
 0xc3b   : > { %v2755_v12 = vsub.f32 %v2749_v9, %v2754_v11 }
 0xc3d   : > { %v2756_v13 = vmul.f32 %v2755_v12, %v2755_v12 }
 0xc3f   : > { %2757 = vadd.xlane.f32.xlu0 %v2756_v13 }
 0xccc   : > { %v2758_v14 = vpop.xlane.xlu0 %2757 }
 0xccd   : > { %v2759_v15 = vmul.f32 0.0078125, %v2758_v14 }
 0xccf   : > { %v2760_v17 = vadd.f32 1e-12, %v2759_v15 }
 0xcd1   : > { %3604 = vrsqrt.f32 %v2760_v17 }
 0xcdb   : > { %v3605_v18 = vpop.eup %3604 }
 0xcdc   : > { %v2762_v20 = vmul.f32 %v3605_v18, %v2755_v12 }
 0xcde   : > { %v2769_v22 = vmul.f32 %v3181_v19, %v2762_v20 }
 0xce0   : > { %v2776_v23 = vadd.f32 %v3182_v21, %v2769_v22 }
 0xce2   : > { %2777 = vst [vmem:[#allocation2] sm:$0xff] %v2776_v23  ;;  %2778 = vst [vmem:[%s4629_s5] sm:$0xff] %v2776_v23 }
 0xce3   : > { %3855 = shalt.err (!%p3852_p11)
}
 0xce4   : > { %s3856_s20 = scalar_lea.hbm %s4945_s6, 128  ;;  %s3860_s19 = scalar_lea.hbm %s5151_s4, 256 }
 0xce5   : > { %p3857_p7 = scmp.ne.s32.totalorder %s4945_s6, %s3856_s20  ;;  %p3861_p10 = scmp.lt.u32.totalorder %s4945_s6, %s5151_s4 }
 0xce6   : > { %p3862_p13 = scmp.lt.u32.totalorder %s3860_s19, %s3856_s20  ;;  %p3864_p5 = scmp.lt.u32.totalorder %s3856_s20, %s4945_s6 }
 0xce7   : > { %p3858_p8 = pnand %p3857_p7, %p5152_p6 }
 0xce8   : > { %p3863_p12 = por %p3862_p13, %p3861_p10 }
 0xce9   : > { %p3859_p1 = pneg %p3858_p8 }
 0xcea   : > { %p3865_p9 = por %p3864_p5, %p3863_p12 }
 0xcec   : > { %p3866_p4 = pnand %p3865_p9, %p3859_p1 }
 0xcee   : > { %3869 = shalt.err (!%p3866_p4)
}
 0xcef   : > { %3358 = dma.vmem_to_hbm [thread:$0]  (%p5152_p6), %s4947_s12, 128, %s4945_s6, %s2780_s30  }
 0xcf0 PF: > { %s5153_s17 = sld [smem:[#allocation27_spill]]  ;;  %s5154_s11 = sld [smem:[#allocation40_spill]] }
 0xcf1   : > { %p3395_p0 = scmp.ge.s32.totalorder %s3992_s0, 2 }
 0xcf6   : > { %s2805_s22 = sand.u32 1, %s5153_s17   ;;  %p5155_p2 = scmp.ne.s32.totalorder %s5154_s11, 0 }
 0xcf7   : > { %s2806_s9 = scalar_lea.sflag [#allocation5], %s2805_s22 }
 0xcf8   : > { %p3387_p3 = pnand %p3395_p0, %p5155_p2 }
 0xcfa   : > { %3947 = dma.done.wait (!%p3387_p3), %s2806_s9, 128  }
 0xcfb   : > { %3949 = vsyncadd (!%p3387_p3), %s2806_s9, 4294967168  ;;  %s36_s0 = sadd.s32 1, %s3992_s0   ;;  %s5156_s21 = sld [smem:[#allocation25_spill]] }
 0xcfc   : > { %p33_p11 = scmp.ge.s32.totalorder %s36_s0, 6   ;;  %s5157_s22 = sld [smem:[#allocation26_spill]] }
 0xcfd   : > { %s5158_s23 = sld [smem:[#allocation38_spill]]  ;;  %s5159_s24 = sld [smem:[#allocation28_spill]] }
 0xcfe   : > { %s5160_s25 = sld [smem:[#allocation29_spill]]  ;;  %s5161_s26 = sld [smem:[#allocation39_spill]] }
 0xcff   : > { %s5162_s27 = sld [smem:[#allocation32_spill]]  ;;  %s5163_s28 = sld [smem:[#allocation33_spill]] }
 0xd00   : > { %s5164_s29 = sld [smem:[#allocation35_spill]]  ;;  %s5165_s30 = sld [smem:[#allocation36_spill]] }
 0xd01   :  { %35 = sbr.rel (!%p33_p11) target bundleno = 30 (0x1e), region = 222 }
 0xd08   :  { %2811 = vsyncpa [#allocation4], 1 }
 0xd09   :  { %2813 = vsyncpa [#allocation4 + $0x1], 1 }
 0xd0a   :  { %2814 = vsyncpa [#allocation7], 1 }
 0xd0b   :  { %2816 = vsyncpa [#allocation7 + $0x1], 1 }
 0xd0c   :  { %2817 = vsyncpa [#allocation10], 1 }
 0xd0d   :  { %2818 = vsyncpa [#allocation5], 1 }
 0xd0e   :  { %2820 = vsyncpa [#allocation5 + $0x1], 1 }

</bundles_post_ra>
